<compile_context>
chip_gen: v7x
topology: tpu7x:2x2x1
jax: 0.10.0
libtpu: 0.0.40
codegen_flags: <defaults>
</compile_context>

<pallas_src>
import functools

import jax
import jax.numpy as jnp
from jax.experimental import pallas as pl
from jax.experimental.pallas import tpu as pltpu


def _pick_strip_height(H, W):
    """Row-strip height: multiple of 8 (or == H), divides H, ~<=1024 rows per strip."""
    cands = [th for th in range(8, H, 8) if H % th == 0]
    if not cands:
        return H
    ok = [th for th in cands if th * W <= 1024]
    return max(ok) if ok else min(cands)


# ----------------------------------------------------------------------------
# Fused kernel:  BN1 -> ReLU -> conv1x1 -> (+b2) -> ReLU -> conv3x3
# grid = (N, n_row_strips); the padded intermediate strip lives in VMEM scratch.
# ----------------------------------------------------------------------------
def _dense_layer_kernel(x_ref, s1_ref, b1_ref, w1_ref, b2_ref, w2_ref, o_ref, a_ref,
                        *, TH, W, C_in, C_mid, C_out):
    r = pl.program_id(1)
    n_strips = pl.num_programs(1)
    row0 = r * TH                           # first output row of this strip

    s1 = s1_ref[...]                        # (1, C_in)      f32
    b1 = b1_ref[...]                        # (1, C_in)      f32
    w1 = w1_ref[...]                        # (C_in, C_mid)  bf16  (BN2 scale folded in)
    b2 = b2_ref[...]                        # (1, C_mid)     f32

    # Zero the padded intermediate scratch: provides the 3x3 conv's zero padding
    # (left/right columns and the top/bottom image borders).
    a_ref[...] = jnp.zeros_like(a_ref)

    def bottleneck(src_row, nrows, dst_row):
        # rows [src_row, src_row + nrows) of x  ->  relu(bn2(conv1(relu(bn1(x)))))
        xr = x_ref[0, pl.ds(src_row, nrows), :, :]                  # (nrows, W, C_in) f32
        xr = xr.reshape(nrows * W, C_in)
        h = jnp.maximum(xr * s1 + b1, 0.0).astype(jnp.bfloat16)     # BN1 + ReLU (f32 math)
        y = jnp.dot(h, w1, preferred_element_type=jnp.float32)      # 1x1 conv on the MXU
        a = jnp.maximum(y + b2, 0.0)                                # BN2 shift + ReLU
        a_ref[dst_row:dst_row + nrows, 1:W + 1, :] = (
            a.astype(a_ref.dtype).reshape(nrows, W, C_mid))

    # Main strip rows -> scratch rows [1, TH+1).
    bottleneck(row0, TH, 1)

    # Halo rows (recomputed from x); at the image border the memset's zeros remain.
    @pl.when(r > 0)
    def _top_halo():
        bottleneck(row0 - 1, 1, 0)

    @pl.when(r < n_strips - 1)
    def _bottom_halo():
        bottleneck(row0 + TH, 1, TH + 1)

    # 3x3 conv, stride 1: 9 shifted bf16 matmuls on the VMEM scratch, f32 accumulation.
    acc = jnp.zeros((TH * W, C_out), jnp.float32)
    for dy in range(3):
        for dx in range(3):
            patch = a_ref[dy:dy + TH, dx:dx + W, :]                 # (TH, W, C_mid) bf16
            patch = patch.reshape(TH * W, C_mid)
            acc = acc + jnp.dot(patch, w2_ref[dy * 3 + dx],
                                preferred_element_type=jnp.float32)

    o_ref[...] = acc.astype(o_ref.dtype)                            # (TH*W, C_out)


# ----------------------------------------------------------------------------
# Wrappers
# ----------------------------------------------------------------------------
def prepare_params(params, eps=1e-5):
    """Fold eval-mode BatchNorm into scale/shift; pre-transpose + bf16-cast weights.

    Call once per layer at load time (weights are not re-laid-out per forward call).
    """
    s1 = params["gamma1"] / jnp.sqrt(params["var1"] + eps)
    b1 = params["beta1"] - params["mean1"] * s1
    s2 = params["gamma2"] / jnp.sqrt(params["var2"] + eps)
    b2 = params["beta2"] - params["mean2"] * s2

    # conv1 weight (C_mid, C_in, 1, 1) -> (C_in, C_mid); fold the BN2 scale into it.
    w1 = jnp.transpose(params["w_conv1"][:, :, 0, 0], (1, 0))
    w1 = (w1 * s2[None, :]).astype(jnp.bfloat16)

    # conv2 weight (C_out, C_mid, 3, 3) -> (ky*kx, C_mid, C_out)
    c_out, c_mid = params["w_conv2"].shape[:2]
    w2 = jnp.transpose(params["w_conv2"], (2, 3, 1, 0)).reshape(9, c_mid, c_out)
    w2 = w2.astype(jnp.bfloat16)

    return {
        "s1": s1.reshape(1, -1).astype(jnp.float32),
        "b1": b1.reshape(1, -1).astype(jnp.float32),
        "w1": w1,
        "b2": b2.reshape(1, -1).astype(jnp.float32),
        "w2": w2,
    }


def dense_layer_forward_nhwc(x_nhwc, prep):
    """Fused _DenseLayer forward on an NHWC input; returns NHWC output."""
    N, H, W, C_in = x_nhwc.shape
    C_mid = prep["w1"].shape[1]
    C_out = prep["w2"].shape[2]

    TH = _pick_strip_height(H, W)
    assert H % TH == 0
    R = H // TH

    # Rough per-step VMEM working set (double-buffered pipeline blocks + scratch),
    # used to set an explicit scoped-VMEM limit that stays within v7x's 64 MiB.
    est = 2 * (H * W * C_in * 4                          # x block (reused across strips)
               + TH * W * C_out * 4                      # output block
               + (C_in * C_mid + 9 * C_mid * C_out) * 2  # bf16 weights
               + (2 * C_in + C_mid) * 4)                 # folded BN vectors
    est += (TH + 2) * (W + 2) * C_mid * 2                # padded intermediate scratch
    vmem_limit = int(min(64 * 2**20, max(32 * 2**20, 2 * est)))

    kernel = functools.partial(_dense_layer_kernel, TH=TH, W=W,
                               C_in=C_in, C_mid=C_mid, C_out=C_out)

    out_flat = pl.pallas_call(
        kernel,
        out_shape=jax.ShapeDtypeStruct((N * H * W, C_out), jnp.float32),
        grid_spec=pltpu.PrefetchScalarGridSpec(
            num_scalar_prefetch=0,
            grid=(N, R),
            in_specs=[
                # Full image per n (block index constant across r -> DMA'd once per n).
                pl.BlockSpec((1, H, W, C_in), lambda n, r: (n, 0, 0, 0)),
                pl.BlockSpec((1, C_in), lambda n, r: (0, 0)),
                pl.BlockSpec((1, C_in), lambda n, r: (0, 0)),
                pl.BlockSpec((C_in, C_mid), lambda n, r: (0, 0)),
                pl.BlockSpec((1, C_mid), lambda n, r: (0, 0)),
                pl.BlockSpec((9, C_mid, C_out), lambda n, r: (0, 0, 0)),
            ],
            out_specs=pl.BlockSpec((TH * W, C_out), lambda n, r: (n * R + r, 0)),
            scratch_shapes=[pltpu.VMEM((TH + 2, W + 2, C_mid), jnp.bfloat16)],
        ),
        compiler_params=pltpu.CompilerParams(
            dimension_semantics=("parallel", "parallel"),
            vmem_limit_bytes=vmem_limit),
    )(x_nhwc, prep["s1"], prep["b1"], prep["w1"], prep["b2"], prep["w2"])

    return out_flat.reshape(N, H, W, C_out)


def dense_layer_forward(x_nchw, params):
    """PyTorch-compatible entry: NCHW in, NCHW out (eval-mode _DenseLayer).

    In a full DenseNet stack, call `prepare_params` once per layer and stay NHWC
    end-to-end via `dense_layer_forward_nhwc` to avoid these per-layer transposes.
    """
    prep = prepare_params(params)
    x_nhwc = jnp.transpose(x_nchw, (0, 2, 3, 1)).astype(jnp.float32)
    y_nhwc = dense_layer_forward_nhwc(x_nhwc, prep)
    return jnp.transpose(y_nhwc, (0, 3, 1, 2))


def init_params(key, num_input_features, growth_rate, bn_size):
    c_in = num_input_features
    c_mid = bn_size * growth_rate
    c_out = growth_rate
    ks = jax.random.split(key, 8)
    return {
        "gamma1": jax.random.uniform(ks[0], (c_in,), jnp.float32, 0.5, 1.5),
        "beta1": jax.random.normal(ks[1], (c_in,), jnp.float32) * 0.1,
        "mean1": jax.random.normal(ks[2], (c_in,), jnp.float32) * 0.1,
        "var1": jax.random.uniform(ks[3], (c_in,), jnp.float32, 0.5, 1.5),
        "w_conv1": jax.random.normal(ks[4], (c_mid, c_in, 1, 1), jnp.float32) * 0.1,
        "gamma2": jax.random.uniform(ks[5], (c_mid,), jnp.float32, 0.5, 1.5),
        "beta2": jax.random.normal(ks[6], (c_mid,), jnp.float32) * 0.1,
        "mean2": jnp.zeros((c_mid,), jnp.float32),
        "var2": jnp.ones((c_mid,), jnp.float32),
        "w_conv2": jax.random.normal(ks[7], (c_out, c_mid, 3, 3), jnp.float32) * 0.1,
    }


if __name__ == "__main__":
    # _DenseLayer(num_input_features=4, growth_rate=8, bn_size=2, drop_rate=0.0), eval mode
    num_input_features, growth_rate, bn_size = 4, 8, 2
    N, H, W = 2, 16, 16

    key = jax.random.PRNGKey(0)
    kx, kp = jax.random.split(key)
    x = jax.random.normal(kx, (N, num_input_features, H, W), jnp.float32)
    params = init_params(kp, num_input_features, growth_rate, bn_size)

    y = jax.jit(dense_layer_forward)(x, params)
    jax.block_until_ready(y)
    assert y.shape == (N, growth_rate, H, W), y.shape

    # Pure-JAX f32 reference (kernel uses bf16 MXU operands -> loosened tolerance)
    eps = 1e-5
    s1 = params["gamma1"] / jnp.sqrt(params["var1"] + eps)
    b1 = params["beta1"] - params["mean1"] * s1
    s2 = params["gamma2"] / jnp.sqrt(params["var2"] + eps)
    b2 = params["beta2"] - params["mean2"] * s2
    h = jnp.maximum(x * s1[None, :, None, None] + b1[None, :, None, None], 0.0)
    bott = jax.lax.conv_general_dilated(h, params["w_conv1"], (1, 1), "VALID",
                                        dimension_numbers=("NCHW", "OIHW", "NCHW"))
    a = jnp.maximum(bott * s2[None, :, None, None] + b2[None, :, None, None], 0.0)
    ref = jax.lax.conv_general_dilated(a, params["w_conv2"], (1, 1), ((1, 1), (1, 1)),
                                       dimension_numbers=("NCHW", "OIHW", "NCHW"))
    err = float(jnp.max(jnp.abs(y - ref)))
    assert jnp.allclose(y, ref, atol=5e-2, rtol=5e-2), err

    print("KERNEL_OK")
</pallas_src>

<mosaic_0001>
module attributes {stable_mosaic.version = 11 : i64} {
  func.func @_dense_layer_kernel(%arg0: i32, %arg1: i32, %arg2: memref<1x16x16x4xf32, #tpu.memory_space<vmem>>, %arg3: memref<1x4xf32, #tpu.memory_space<vmem>>, %arg4: memref<1x4xf32, #tpu.memory_space<vmem>>, %arg5: memref<4x16xbf16, #tpu.memory_space<vmem>>, %arg6: memref<1x16xf32, #tpu.memory_space<vmem>>, %arg7: memref<9x16x8xbf16, #tpu.memory_space<vmem>>, %arg8: memref<128x8xf32, #tpu.memory_space<vmem>>, %arg9: memref<10x18x16xbf16, #tpu.memory_space<vmem>>) attributes {dimension_semantics = [#tpu.dimension_semantics<parallel>, #tpu.dimension_semantics<parallel>], iteration_bounds = array<i64: 2, 2>, scalar_prefetch = 0 : i64, scratch_operands = 1 : i64, tpu.core_type = #tpu.core_type<tc>, window_params = [{transform_indices = @transform_0, window_bounds = array<i64: 1, 16, 16, 4>}, {pipeline_mode = #tpu.pipeline_mode<synchronous>, transform_indices = @transform_1, window_bounds = array<i64: 1, 4>}, {pipeline_mode = #tpu.pipeline_mode<synchronous>, transform_indices = @transform_2, window_bounds = array<i64: 1, 4>}, {pipeline_mode = #tpu.pipeline_mode<synchronous>, transform_indices = @transform_3, window_bounds = array<i64: 4, 16>}, {pipeline_mode = #tpu.pipeline_mode<synchronous>, transform_indices = @transform_4, window_bounds = array<i64: 1, 16>}, {pipeline_mode = #tpu.pipeline_mode<synchronous>, transform_indices = @transform_5, window_bounds = array<i64: 9, 16, 8>}, {transform_indices = @transform_6, window_bounds = array<i64: 128, 8>}]} {
    %c8_i32 = arith.constant 8 : i32
    %0 = arith.muli %arg1, %c8_i32 : i32
    %c0 = arith.constant 0 : index
    %c0_0 = arith.constant 0 : index
    %1 = vector.load %arg3[%c0, %c0_0] : memref<1x4xf32, #tpu.memory_space<vmem>>, vector<1x4xf32>
    %c0_1 = arith.constant 0 : index
    %c0_2 = arith.constant 0 : index
    %2 = vector.load %arg4[%c0_1, %c0_2] : memref<1x4xf32, #tpu.memory_space<vmem>>, vector<1x4xf32>
    %c0_3 = arith.constant 0 : index
    %c0_4 = arith.constant 0 : index
    %3 = vector.load %arg5[%c0_3, %c0_4] : memref<4x16xbf16, #tpu.memory_space<vmem>>, vector<4x16xbf16>
    %c0_5 = arith.constant 0 : index
    %c0_6 = arith.constant 0 : index
    %4 = vector.load %arg6[%c0_5, %c0_6] : memref<1x16xf32, #tpu.memory_space<vmem>>, vector<1x16xf32>
    %cst = arith.constant 0.000000e+00 : bf16
    %5 = vector.broadcast %cst : bf16 to vector<10x18x16xbf16>
    %c0_7 = arith.constant 0 : index
    %c0_8 = arith.constant 0 : index
    %c0_9 = arith.constant 0 : index
    %6 = vector.load %arg9[%c0_7, %c0_8, %c0_9] : memref<10x18x16xbf16, #tpu.memory_space<vmem>>, vector<10x18x16xbf16>
    tpu.vector_store %arg9[%c0_7, %c0_8, %c0_9], %5 {strides = array<i32>} : memref<10x18x16xbf16, #tpu.memory_space<vmem>>, vector<10x18x16xbf16>,
    %c0_10 = arith.constant 0 : index
    %7 = arith.index_cast %0 : i32 to index
    %c0_11 = arith.constant 0 : index
    %c0_12 = arith.constant 0 : index
    %8 = vector.load %arg2[%c0_10, %7, %c0_11, %c0_12] : memref<1x16x16x4xf32, #tpu.memory_space<vmem>>, vector<1x8x16x4xf32>
    %9 = vector.shape_cast %8 : vector<1x8x16x4xf32> to vector<8x16x4xf32>
    %10 = vector.shape_cast %9 : vector<8x16x4xf32> to vector<128x4xf32>
    %11 = vector.broadcast %1 : vector<1x4xf32> to vector<128x4xf32>
    %12 = arith.mulf %10, %11 : vector<128x4xf32>
    %13 = vector.broadcast %2 : vector<1x4xf32> to vector<128x4xf32>
    %14 = arith.addf %12, %13 : vector<128x4xf32>
    %cst_13 = arith.constant 0.000000e+00 : f32
    %15 = vector.broadcast %cst_13 : f32 to vector<128x4xf32>
    %16 = arith.maximumf %14, %15 : vector<128x4xf32>
    %17 = arith.truncf %16 : vector<128x4xf32> to vector<128x4xbf16>
    %cst_14 = arith.constant dense<0.000000e+00> : vector<128x16xf32>
    %18 = tpu.matmul %17, %3, %cst_14 {dimension_numbers = #tpu.dot_dimension_numbers<[1], [0], [0], [1], [0, 0, 1, 1], [], []>} : vector<128x4xbf16>, vector<4x16xbf16>, vector<128x16xf32> -> vector<128x16xf32>
    %19 = vector.broadcast %4 : vector<1x16xf32> to vector<128x16xf32>
    %20 = arith.addf %18, %19 : vector<128x16xf32>
    %cst_15 = arith.constant 0.000000e+00 : f32
    %21 = vector.broadcast %cst_15 : f32 to vector<128x16xf32>
    %22 = arith.maximumf %20, %21 : vector<128x16xf32>
    %23 = arith.truncf %22 : vector<128x16xf32> to vector<128x16xbf16>
    %24 = vector.shape_cast %23 : vector<128x16xbf16> to vector<8x16x16xbf16>
    %c1 = arith.constant 1 : index
    %c1_16 = arith.constant 1 : index
    %c0_17 = arith.constant 0 : index
    %25 = vector.load %arg9[%c1, %c1_16, %c0_17] : memref<10x18x16xbf16, #tpu.memory_space<vmem>>, vector<8x16x16xbf16>
    tpu.vector_store %arg9[%c1, %c1_16, %c0_17], %24 {strides = array<i32>} : memref<10x18x16xbf16, #tpu.memory_space<vmem>>, vector<8x16x16xbf16>,
    %c0_i32 = arith.constant 0 : i32
    %26 = arith.cmpi sgt, %arg1, %c0_i32 : i32
    %27 = arith.extui %26 : i1 to i32
    %c0_i32_18 = arith.constant 0 : i32
    %28 = arith.cmpi ne, %27, %c0_i32_18 : i32
    scf.if %28 {
      %c1_i32_79 = arith.constant 1 : i32
      %88 = arith.subi %0, %c1_i32_79 : i32
      %c0_80 = arith.constant 0 : index
      %89 = arith.index_cast %88 : i32 to index
      %c0_81 = arith.constant 0 : index
      %c0_82 = arith.constant 0 : index
      %90 = vector.load %arg2[%c0_80, %89, %c0_81, %c0_82] : memref<1x16x16x4xf32, #tpu.memory_space<vmem>>, vector<1x1x16x4xf32>
      %91 = vector.shape_cast %90 : vector<1x1x16x4xf32> to vector<1x16x4xf32>
      %92 = vector.shape_cast %91 : vector<1x16x4xf32> to vector<16x4xf32>
      %93 = vector.broadcast %1 : vector<1x4xf32> to vector<16x4xf32>
      %94 = arith.mulf %92, %93 : vector<16x4xf32>
      %95 = vector.broadcast %2 : vector<1x4xf32> to vector<16x4xf32>
      %96 = arith.addf %94, %95 : vector<16x4xf32>
      %cst_83 = arith.constant 0.000000e+00 : f32
      %97 = vector.broadcast %cst_83 : f32 to vector<16x4xf32>
      %98 = arith.maximumf %96, %97 : vector<16x4xf32>
      %99 = arith.truncf %98 : vector<16x4xf32> to vector<16x4xbf16>
      %cst_84 = arith.constant dense<0.000000e+00> : vector<16x16xf32>
      %100 = tpu.matmul %99, %3, %cst_84 {dimension_numbers = #tpu.dot_dimension_numbers<[1], [0], [0], [1], [0, 0, 1, 1], [], []>} : vector<16x4xbf16>, vector<4x16xbf16>, vector<16x16xf32> -> vector<16x16xf32>
      %101 = vector.broadcast %4 : vector<1x16xf32> to vector<16x16xf32>
      %102 = arith.addf %100, %101 : vector<16x16xf32>
      %cst_85 = arith.constant 0.000000e+00 : f32
      %103 = vector.broadcast %cst_85 : f32 to vector<16x16xf32>
      %104 = arith.maximumf %102, %103 : vector<16x16xf32>
      %105 = arith.truncf %104 : vector<16x16xf32> to vector<16x16xbf16>
      %106 = vector.shape_cast %105 : vector<16x16xbf16> to vector<1x16x16xbf16>
      %c0_86 = arith.constant 0 : index
      %c1_87 = arith.constant 1 : index
      %c0_88 = arith.constant 0 : index
      %107 = vector.load %arg9[%c0_86, %c1_87, %c0_88] : memref<10x18x16xbf16, #tpu.memory_space<vmem>>, vector<1x16x16xbf16>
      tpu.vector_store %arg9[%c0_86, %c1_87, %c0_88], %106 {strides = array<i32>} : memref<10x18x16xbf16, #tpu.memory_space<vmem>>, vector<1x16x16xbf16>,
    } else {
    }
    %c1_i32 = arith.constant 1 : i32
    %29 = arith.cmpi slt, %arg1, %c1_i32 : i32
    %30 = arith.extui %29 : i1 to i32
    %c0_i32_19 = arith.constant 0 : i32
    %31 = arith.cmpi ne, %30, %c0_i32_19 : i32
    scf.if %31 {
      %c8_i32_79 = arith.constant 8 : i32
      %88 = arith.addi %0, %c8_i32_79 : i32
      %c0_80 = arith.constant 0 : index
      %89 = arith.index_cast %88 : i32 to index
      %c0_81 = arith.constant 0 : index
      %c0_82 = arith.constant 0 : index
      %90 = vector.load %arg2[%c0_80, %89, %c0_81, %c0_82] : memref<1x16x16x4xf32, #tpu.memory_space<vmem>>, vector<1x1x16x4xf32>
      %91 = vector.shape_cast %90 : vector<1x1x16x4xf32> to vector<1x16x4xf32>
      %92 = vector.shape_cast %91 : vector<1x16x4xf32> to vector<16x4xf32>
      %93 = vector.broadcast %1 : vector<1x4xf32> to vector<16x4xf32>
      %94 = arith.mulf %92, %93 : vector<16x4xf32>
      %95 = vector.broadcast %2 : vector<1x4xf32> to vector<16x4xf32>
      %96 = arith.addf %94, %95 : vector<16x4xf32>
      %cst_83 = arith.constant 0.000000e+00 : f32
      %97 = vector.broadcast %cst_83 : f32 to vector<16x4xf32>
      %98 = arith.maximumf %96, %97 : vector<16x4xf32>
      %99 = arith.truncf %98 : vector<16x4xf32> to vector<16x4xbf16>
      %cst_84 = arith.constant dense<0.000000e+00> : vector<16x16xf32>
      %100 = tpu.matmul %99, %3, %cst_84 {dimension_numbers = #tpu.dot_dimension_numbers<[1], [0], [0], [1], [0, 0, 1, 1], [], []>} : vector<16x4xbf16>, vector<4x16xbf16>, vector<16x16xf32> -> vector<16x16xf32>
      %101 = vector.broadcast %4 : vector<1x16xf32> to vector<16x16xf32>
      %102 = arith.addf %100, %101 : vector<16x16xf32>
      %cst_85 = arith.constant 0.000000e+00 : f32
      %103 = vector.broadcast %cst_85 : f32 to vector<16x16xf32>
      %104 = arith.maximumf %102, %103 : vector<16x16xf32>
      %105 = arith.truncf %104 : vector<16x16xf32> to vector<16x16xbf16>
      %106 = vector.shape_cast %105 : vector<16x16xbf16> to vector<1x16x16xbf16>
      %c9 = arith.constant 9 : index
      %c1_86 = arith.constant 1 : index
      %c0_87 = arith.constant 0 : index
      %107 = vector.load %arg9[%c9, %c1_86, %c0_87] : memref<10x18x16xbf16, #tpu.memory_space<vmem>>, vector<1x16x16xbf16>
      tpu.vector_store %arg9[%c9, %c1_86, %c0_87], %106 {strides = array<i32>} : memref<10x18x16xbf16, #tpu.memory_space<vmem>>, vector<1x16x16xbf16>,
    } else {
    }
    %cst_20 = arith.constant 0.000000e+00 : f32
    %32 = vector.broadcast %cst_20 : f32 to vector<128x8xf32>
    %c0_21 = arith.constant 0 : index
    %c0_22 = arith.constant 0 : index
    %c0_23 = arith.constant 0 : index
    %33 = vector.load %arg9[%c0_21, %c0_22, %c0_23] : memref<10x18x16xbf16, #tpu.memory_space<vmem>>, vector<8x16x16xbf16>
    %34 = vector.shape_cast %33 : vector<8x16x16xbf16> to vector<128x16xbf16>
    %c0_24 = arith.constant 0 : index
    %c0_25 = arith.constant 0 : index
    %c0_26 = arith.constant 0 : index
    %35 = vector.load %arg7[%c0_24, %c0_25, %c0_26] : memref<9x16x8xbf16, #tpu.memory_space<vmem>>, vector<1x16x8xbf16>
    %36 = vector.shape_cast %35 : vector<1x16x8xbf16> to vector<16x8xbf16>
    %cst_27 = arith.constant dense<0.000000e+00> : vector<128x8xf32>
    %37 = tpu.matmul %34, %36, %cst_27 {dimension_numbers = #tpu.dot_dimension_numbers<[1], [0], [0], [1], [0, 0, 1, 1], [], []>} : vector<128x16xbf16>, vector<16x8xbf16>, vector<128x8xf32> -> vector<128x8xf32>
    %38 = arith.addf %32, %37 : vector<128x8xf32>
    %c0_28 = arith.constant 0 : index
    %c1_29 = arith.constant 1 : index
    %c0_30 = arith.constant 0 : index
    %39 = vector.load %arg9[%c0_28, %c1_29, %c0_30] : memref<10x18x16xbf16, #tpu.memory_space<vmem>>, vector<8x16x16xbf16>
    %40 = vector.shape_cast %39 : vector<8x16x16xbf16> to vector<128x16xbf16>
    %c1_31 = arith.constant 1 : index
    %c0_32 = arith.constant 0 : index
    %c0_33 = arith.constant 0 : index
    %41 = vector.load %arg7[%c1_31, %c0_32, %c0_33] : memref<9x16x8xbf16, #tpu.memory_space<vmem>>, vector<1x16x8xbf16>
    %42 = vector.shape_cast %41 : vector<1x16x8xbf16> to vector<16x8xbf16>
    %cst_34 = arith.constant dense<0.000000e+00> : vector<128x8xf32>
    %43 = tpu.matmul %40, %42, %cst_34 {dimension_numbers = #tpu.dot_dimension_numbers<[1], [0], [0], [1], [0, 0, 1, 1], [], []>} : vector<128x16xbf16>, vector<16x8xbf16>, vector<128x8xf32> -> vector<128x8xf32>
    %44 = arith.addf %38, %43 : vector<128x8xf32>
    %c0_35 = arith.constant 0 : index
    %c2 = arith.constant 2 : index
    %c0_36 = arith.constant 0 : index
    %45 = vector.load %arg9[%c0_35, %c2, %c0_36] : memref<10x18x16xbf16, #tpu.memory_space<vmem>>, vector<8x16x16xbf16>
    %46 = vector.shape_cast %45 : vector<8x16x16xbf16> to vector<128x16xbf16>
    %c2_37 = arith.constant 2 : index
    %c0_38 = arith.constant 0 : index
    %c0_39 = arith.constant 0 : index
    %47 = vector.load %arg7[%c2_37, %c0_38, %c0_39] : memref<9x16x8xbf16, #tpu.memory_space<vmem>>, vector<1x16x8xbf16>
    %48 = vector.shape_cast %47 : vector<1x16x8xbf16> to vector<16x8xbf16>
    %cst_40 = arith.constant dense<0.000000e+00> : vector<128x8xf32>
    %49 = tpu.matmul %46, %48, %cst_40 {dimension_numbers = #tpu.dot_dimension_numbers<[1], [0], [0], [1], [0, 0, 1, 1], [], []>} : vector<128x16xbf16>, vector<16x8xbf16>, vector<128x8xf32> -> vector<128x8xf32>
    %50 = arith.addf %44, %49 : vector<128x8xf32>
    %c1_41 = arith.constant 1 : index
    %c0_42 = arith.constant 0 : index
    %c0_43 = arith.constant 0 : index
    %51 = vector.load %arg9[%c1_41, %c0_42, %c0_43] : memref<10x18x16xbf16, #tpu.memory_space<vmem>>, vector<8x16x16xbf16>
    %52 = vector.shape_cast %51 : vector<8x16x16xbf16> to vector<128x16xbf16>
    %c3 = arith.constant 3 : index
    %c0_44 = arith.constant 0 : index
    %c0_45 = arith.constant 0 : index
    %53 = vector.load %arg7[%c3, %c0_44, %c0_45] : memref<9x16x8xbf16, #tpu.memory_space<vmem>>, vector<1x16x8xbf16>
    %54 = vector.shape_cast %53 : vector<1x16x8xbf16> to vector<16x8xbf16>
    %cst_46 = arith.constant dense<0.000000e+00> : vector<128x8xf32>
    %55 = tpu.matmul %52, %54, %cst_46 {dimension_numbers = #tpu.dot_dimension_numbers<[1], [0], [0], [1], [0, 0, 1, 1], [], []>} : vector<128x16xbf16>, vector<16x8xbf16>, vector<128x8xf32> -> vector<128x8xf32>
    %56 = arith.addf %50, %55 : vector<128x8xf32>
    %c1_47 = arith.constant 1 : index
    %c1_48 = arith.constant 1 : index
    %c0_49 = arith.constant 0 : index
    %57 = vector.load %arg9[%c1_47, %c1_48, %c0_49] : memref<10x18x16xbf16, #tpu.memory_space<vmem>>, vector<8x16x16xbf16>
    %58 = vector.shape_cast %57 : vector<8x16x16xbf16> to vector<128x16xbf16>
    %c4 = arith.constant 4 : index
    %c0_50 = arith.constant 0 : index
    %c0_51 = arith.constant 0 : index
    %59 = vector.load %arg7[%c4, %c0_50, %c0_51] : memref<9x16x8xbf16, #tpu.memory_space<vmem>>, vector<1x16x8xbf16>
    %60 = vector.shape_cast %59 : vector<1x16x8xbf16> to vector<16x8xbf16>
    %cst_52 = arith.constant dense<0.000000e+00> : vector<128x8xf32>
    %61 = tpu.matmul %58, %60, %cst_52 {dimension_numbers = #tpu.dot_dimension_numbers<[1], [0], [0], [1], [0, 0, 1, 1], [], []>} : vector<128x16xbf16>, vector<16x8xbf16>, vector<128x8xf32> -> vector<128x8xf32>
    %62 = arith.addf %56, %61 : vector<128x8xf32>
    %c1_53 = arith.constant 1 : index
    %c2_54 = arith.constant 2 : index
    %c0_55 = arith.constant 0 : index
    %63 = vector.load %arg9[%c1_53, %c2_54, %c0_55] : memref<10x18x16xbf16, #tpu.memory_space<vmem>>, vector<8x16x16xbf16>
    %64 = vector.shape_cast %63 : vector<8x16x16xbf16> to vector<128x16xbf16>
    %c5 = arith.constant 5 : index
    %c0_56 = arith.constant 0 : index
    %c0_57 = arith.constant 0 : index
    %65 = vector.load %arg7[%c5, %c0_56, %c0_57] : memref<9x16x8xbf16, #tpu.memory_space<vmem>>, vector<1x16x8xbf16>
    %66 = vector.shape_cast %65 : vector<1x16x8xbf16> to vector<16x8xbf16>
    %cst_58 = arith.constant dense<0.000000e+00> : vector<128x8xf32>
    %67 = tpu.matmul %64, %66, %cst_58 {dimension_numbers = #tpu.dot_dimension_numbers<[1], [0], [0], [1], [0, 0, 1, 1], [], []>} : vector<128x16xbf16>, vector<16x8xbf16>, vector<128x8xf32> -> vector<128x8xf32>
    %68 = arith.addf %62, %67 : vector<128x8xf32>
    %c2_59 = arith.constant 2 : index
    %c0_60 = arith.constant 0 : index
    %c0_61 = arith.constant 0 : index
    %69 = vector.load %arg9[%c2_59, %c0_60, %c0_61] : memref<10x18x16xbf16, #tpu.memory_space<vmem>>, vector<8x16x16xbf16>
    %70 = vector.shape_cast %69 : vector<8x16x16xbf16> to vector<128x16xbf16>
    %c6 = arith.constant 6 : index
    %c0_62 = arith.constant 0 : index
    %c0_63 = arith.constant 0 : index
    %71 = vector.load %arg7[%c6, %c0_62, %c0_63] : memref<9x16x8xbf16, #tpu.memory_space<vmem>>, vector<1x16x8xbf16>
    %72 = vector.shape_cast %71 : vector<1x16x8xbf16> to vector<16x8xbf16>
    %cst_64 = arith.constant dense<0.000000e+00> : vector<128x8xf32>
    %73 = tpu.matmul %70, %72, %cst_64 {dimension_numbers = #tpu.dot_dimension_numbers<[1], [0], [0], [1], [0, 0, 1, 1], [], []>} : vector<128x16xbf16>, vector<16x8xbf16>, vector<128x8xf32> -> vector<128x8xf32>
    %74 = arith.addf %68, %73 : vector<128x8xf32>
    %c2_65 = arith.constant 2 : index
    %c1_66 = arith.constant 1 : index
    %c0_67 = arith.constant 0 : index
    %75 = vector.load %arg9[%c2_65, %c1_66, %c0_67] : memref<10x18x16xbf16, #tpu.memory_space<vmem>>, vector<8x16x16xbf16>
    %76 = vector.shape_cast %75 : vector<8x16x16xbf16> to vector<128x16xbf16>
    %c7 = arith.constant 7 : index
    %c0_68 = arith.constant 0 : index
    %c0_69 = arith.constant 0 : index
    %77 = vector.load %arg7[%c7, %c0_68, %c0_69] : memref<9x16x8xbf16, #tpu.memory_space<vmem>>, vector<1x16x8xbf16>
    %78 = vector.shape_cast %77 : vector<1x16x8xbf16> to vector<16x8xbf16>
    %cst_70 = arith.constant dense<0.000000e+00> : vector<128x8xf32>
    %79 = tpu.matmul %76, %78, %cst_70 {dimension_numbers = #tpu.dot_dimension_numbers<[1], [0], [0], [1], [0, 0, 1, 1], [], []>} : vector<128x16xbf16>, vector<16x8xbf16>, vector<128x8xf32> -> vector<128x8xf32>
    %80 = arith.addf %74, %79 : vector<128x8xf32>
    %c2_71 = arith.constant 2 : index
    %c2_72 = arith.constant 2 : index
    %c0_73 = arith.constant 0 : index
    %81 = vector.load %arg9[%c2_71, %c2_72, %c0_73] : memref<10x18x16xbf16, #tpu.memory_space<vmem>>, vector<8x16x16xbf16>
    %82 = vector.shape_cast %81 : vector<8x16x16xbf16> to vector<128x16xbf16>
    %c8 = arith.constant 8 : index
    %c0_74 = arith.constant 0 : index
    %c0_75 = arith.constant 0 : index
    %83 = vector.load %arg7[%c8, %c0_74, %c0_75] : memref<9x16x8xbf16, #tpu.memory_space<vmem>>, vector<1x16x8xbf16>
    %84 = vector.shape_cast %83 : vector<1x16x8xbf16> to vector<16x8xbf16>
    %cst_76 = arith.constant dense<0.000000e+00> : vector<128x8xf32>
    %85 = tpu.matmul %82, %84, %cst_76 {dimension_numbers = #tpu.dot_dimension_numbers<[1], [0], [0], [1], [0, 0, 1, 1], [], []>} : vector<128x16xbf16>, vector<16x8xbf16>, vector<128x8xf32> -> vector<128x8xf32>
    %86 = arith.addf %80, %85 : vector<128x8xf32>
    %c0_77 = arith.constant 0 : index
    %c0_78 = arith.constant 0 : index
    %87 = vector.load %arg8[%c0_77, %c0_78] : memref<128x8xf32, #tpu.memory_space<vmem>>, vector<128x8xf32>
    tpu.vector_store %arg8[%c0_77, %c0_78], %86 {strides = array<i32>} : memref<128x8xf32, #tpu.memory_space<vmem>>, vector<128x8xf32>,
    return
  }
  func.func @transform_0(%arg0: i32, %arg1: i32) -> (i32, i32, i32, i32) {
    %c0_i32 = arith.constant 0 : i32
    %c0_i32_0 = arith.constant 0 : i32
    %c0_i32_1 = arith.constant 0 : i32
    %c0_i32_2 = arith.constant 0 : i32
    return %arg0, %c0_i32, %c0_i32_0, %c0_i32_1 : i32, i32, i32, i32
  }
  func.func @transform_1(%arg0: i32, %arg1: i32) -> (i32, i32) {
    %c0_i32 = arith.constant 0 : i32
    %c0_i32_0 = arith.constant 0 : i32
    %c0_i32_1 = arith.constant 0 : i32
    return %c0_i32, %c0_i32_0 : i32, i32
  }
  func.func @transform_2(%arg0: i32, %arg1: i32) -> (i32, i32) {
    %c0_i32 = arith.constant 0 : i32
    %c0_i32_0 = arith.constant 0 : i32
    %c0_i32_1 = arith.constant 0 : i32
    return %c0_i32, %c0_i32_0 : i32, i32
  }
  func.func @transform_3(%arg0: i32, %arg1: i32) -> (i32, i32) {
    %c0_i32 = arith.constant 0 : i32
    %c0_i32_0 = arith.constant 0 : i32
    %c0_i32_1 = arith.constant 0 : i32
    return %c0_i32, %c0_i32_0 : i32, i32
  }
  func.func @transform_4(%arg0: i32, %arg1: i32) -> (i32, i32) {
    %c0_i32 = arith.constant 0 : i32
    %c0_i32_0 = arith.constant 0 : i32
    %c0_i32_1 = arith.constant 0 : i32
    return %c0_i32, %c0_i32_0 : i32, i32
  }
  func.func @transform_5(%arg0: i32, %arg1: i32) -> (i32, i32, i32) {
    %c0_i32 = arith.constant 0 : i32
    %c0_i32_0 = arith.constant 0 : i32
    %c0_i32_1 = arith.constant 0 : i32
    %c0_i32_2 = arith.constant 0 : i32
    return %c0_i32, %c0_i32_0, %c0_i32_1 : i32, i32, i32
  }
  func.func @transform_6(%arg0: i32, %arg1: i32) -> (i32, i32) {
    %c2_i32 = arith.constant 2 : i32
    %0 = arith.muli %arg0, %c2_i32 : i32
    %1 = arith.addi %0, %arg1 : i32
    %c0_i32 = arith.constant 0 : i32
    %c0_i32_0 = arith.constant 0 : i32
    return %1, %c0_i32 : i32, i32
  }
}

</mosaic_0001>

<bundles_post_ra>
// kernel: dense_layer_forward.1
= control target key start
LH: loop header
LB: loop body
LE: loop exit
PB: predicated region body
PF: predicated region fallthrough
CT: control target
= control target key end

     0   :  { %s4451_s21 = smov 0   ;;  %s4453_s22 = smov 0   ;;  %s5593_s0 = inlined_call_operand.vmem [shape: f32[2,16,16,4], index: 0, kind: input, shape index: {}]   ;;  %s5594_s1 = inlined_call_operand.vmem [shape: f32[1,4], index: 1, kind: input, shape index: {}]   ;;  %s5595_s2 = inlined_call_operand.vmem [shape: f32[1,4], index: 2, kind: input, shape index: {}]   ;;  %s5596_s3 = inlined_call_operand.vmem [shape: bf16[4,16], index: 3, kind: input, shape index: {}]   ;;  %s5597_s4 = inlined_call_operand.vmem [shape: f32[1,16], index: 4, kind: input, shape index: {}]   ;;  %s5598_s5 = inlined_call_operand.vmem [shape: bf16[9,16,8], index: 5, kind: input, shape index: {}]   ;;  %s5599_s6 = inlined_call_operand.vmem [shape: f32[512,8], index: 6, kind: output, shape index: {}]  }
   0x1   :  { %s4455_s23 = smov 0   ;;  %s4457_s24 = smov 0  }
   0x2   :  { %s4459_s25 = smov 0  }
   0x3 LB: > { %s25_s26 = sadd.s32 1, %s4401_s23  ;;  %s28_s27 = sadd.s32 1, %s4405_s24  ;;  %s4409_s25 = sphi %s4459_s25, %s16_s25   ;;  %s4405_s24 = sphi %s4457_s24, %s5622_s24   ;;  %s4401_s23 = sphi %s4455_s23, %s5621_s23   ;;  %s4397_s22 = sphi %s4453_s22, %s5620_s22   ;;  %s4393_s21 = sphi %s4451_s21, %s5619_s21  }
   0x4   : > { %p26_p0 = scmp.ge.s32.totalorder %s25_s26, 2  ;;  %p3605_p1 = scmp.ge.s32.totalorder %s4409_s25, 1 }
   0x5   : > { %p228_p2 = scmp.lt.s32.totalorder %s4409_s25, 5 }
   0x6   : > { %s5624_s26 = smov (%p26_p0, %s25_s26), 0  ;;  %s5626_s27 = smov (!%p26_p0, %s28_s27), %s4405_s24 }
   0x7   : > { %p229_p3 = pnand %p3605_p1, %p228_p2  ;;  %p30_p4 = scmp.ge.s32.totalorder %s5626_s27, 2 }
   0x9   : > { %s5628_s27 = smov (%p30_p4, %s5626_s27), 0  ;;  %232 = sbr.rel (%p229_p3) target bundleno = 1156 (0x484), region = 44 }
  0x10   : > { %s3608_s28 = sshll.u32 %s4397_s22, 1  ;;  %s3611_s29 = sshll.u32 %s4393_s21, 3  ;;  %v279_v0 = vld [vmem:[%s5596_s3] sm:$0x3]  ;;  %vm430_vm0 = vcmask 1041408   ;;  %vm281_vm1 = vcmask 125952  }
  0x11   : > { %s4491_s8 = sadd.s32 %s4393_s21, %s3608_s28  ;;  %4290 = vmatprep.subr.msk.bf16.mxu0 %vm430_vm0, %v279_v0  ;;  %4291 = vmatprep.subr.msk.bf16.mxu1 %vm430_vm0, %v279_v0  ;;  %v4493_v1 = vsel %vm430_vm0, %v279_v0, 0  ;;  %p260_p5 = scmp.lt.s32.totalorder %s4397_s22, 1  ;;  %v4411_v2 = vmov 0   ;;  %v4557_v3 = vld [vmem:[%s5594_s1] ss:$0 sm:$0xff]  ;;  %vm405_vm2 = vcmask 31744  }
  0x12   : > { %s3609_s9 = sshll.u32 %s4491_s8, 4  ;;  %3967 = vmatpush3.bf16.msra.mxu0 %v4493_v1  ;;  %4159 = vmatpush3.bf16.msra.mxu1 %v4493_v1  ;;  %s3850_s11 = sshll.u32 %s4393_s21, 7  ;;  %282 = vst.msk [vmem:[#allocation2] sm:$0xf] %vm281_vm1, %v4411_v2  ;;  %283 = vst.msk [vmem:[#allocation2 + $0x4] sm:$0xf] %vm281_vm1, %v4411_v2 }
  0x13   : > { %p4499_p6 = scmp.lt.s32.totalorder %s3609_s9, 63  ;;  %289 = vst.msk [vmem:[#allocation2 + $0x18] sm:$0xf] %vm281_vm1, %v4411_v2  ;;  %310 = vst.msk [vmem:[#allocation2 + $0x6c] sm:$0xf] %vm281_vm1, %v4411_v2  ;;  %s5630_s22 = smov (!%p260_p5, %s4397_s22), 1 }
  0x14   : > { %311 = vst.msk [vmem:[#allocation2 + $0x70] sm:$0xf] %vm281_vm1, %v4411_v2  ;;  %286 = vst.msk [vmem:[#allocation2 + $0xc] sm:$0xf] %vm281_vm1, %v4411_v2  ;;  %s3849_s12 = sshll.u32 %s5630_s22, 8  ;;  %vm284_vm3 = vcmask 122880  }
  0x15   : > { %287 = vst.msk [vmem:[#allocation2 + $0x10] sm:$0xf] %vm281_vm1, %v4411_v2  ;;  %290 = vst.msk [vmem:[#allocation2 + $0x1c] sm:$0xf] %vm281_vm1, %v4411_v2  ;;  %s5632_s9 = smov (!%p4499_p6, %s3609_s9), 63  ;;  %s4552_s16 = scalar_lea.vmem %s5593_s0, %s3849_s12 }
  0x16   : > { %292 = vst.msk [vmem:[#allocation2 + $0x24] sm:$0xf] %vm281_vm1, %v4411_v2  ;;  %293 = vst.msk [vmem:[#allocation2 + $0x28] sm:$0xf] %vm281_vm1, %v4411_v2  ;;  %s3610_s13 = sshll.u32 %s5632_s9, 3  ;;  %s4572_s22 = scalar_lea.vmem %s4552_s16, %s3850_s11 }
  0x17   : > { %295 = vst.msk [vmem:[#allocation2 + $0x30] sm:$0xf] %vm281_vm1, %v4411_v2  ;;  %296 = vst.msk [vmem:[#allocation2 + $0x34] sm:$0xf] %vm281_vm1, %v4411_v2  ;;  %s4562_s28 = scalar_lea.vmem %s5599_s6, %s3610_s13  ;;  %v4567_v4 = vld [vmem:[%s5595_s2] ss:$0 sm:$0xff] }
  0x18   : > { %298 = vst.msk [vmem:[#allocation2 + $0x3c] sm:$0xf] %vm281_vm1, %v4411_v2  ;;  %299 = vst.msk [vmem:[#allocation2 + $0x40] sm:$0xf] %vm281_vm1, %v4411_v2  ;;  %v315_v5 = vld [vmem:[%s4572_s22] sm:$0xff]  ;;  %v316_v6 = vld [vmem:[%s4572_s22 + $0x8] sm:$0xff] }
  0x19   : > { %301 = vst.msk [vmem:[#allocation2 + $0x48] sm:$0xf] %vm281_vm1, %v4411_v2  ;;  %302 = vst.msk [vmem:[#allocation2 + $0x4c] sm:$0xf] %vm281_vm1, %v4411_v2  ;;  %v323_v7 = vld [vmem:[%s4572_s22 + $0x40] sm:$0xff]  ;;  %v337_v8 = vmul.f32 %v4557_v3, %v315_v5  ;;  %v338_v9 = vmul.f32 %v4557_v3, %v316_v6  ;;  %v324_v10 = vld [vmem:[%s4572_s22 + $0x48] sm:$0xff] }
  0x1a   : > { %304 = vst.msk [vmem:[#allocation2 + $0x54] sm:$0xf] %vm281_vm1, %v4411_v2  ;;  %305 = vst.msk [vmem:[#allocation2 + $0x58] sm:$0xf] %vm281_vm1, %v4411_v2  ;;  %v345_v11 = vmul.f32 %v4557_v3, %v323_v7  ;;  %v317_v12 = vld [vmem:[%s4572_s22 + $0x10] sm:$0xff]  ;;  %v318_v13 = vld [vmem:[%s4572_s22 + $0x18] sm:$0xff]  ;;  %v346_v14 = vmul.f32 %v4557_v3, %v324_v10 }
  0x1b   : > { %307 = vst.msk [vmem:[#allocation2 + $0x60] sm:$0xf] %vm281_vm1, %v4411_v2  ;;  %308 = vst.msk [vmem:[#allocation2 + $0x64] sm:$0xf] %vm281_vm1, %v4411_v2  ;;  %v339_v15 = vmul.f32 %v4557_v3, %v317_v12  ;;  %v340_v16 = vmul.f32 %v4557_v3, %v318_v13  ;;  %v325_v17 = vld [vmem:[%s4572_s22 + $0x50] sm:$0xff]  ;;  %v326_v18 = vld [vmem:[%s4572_s22 + $0x58] sm:$0xff]  ;;  %v359_v19 = vadd.f32 %v4567_v4, %v337_v8 }
  0x1c   : > { %v360_v20 = vadd.f32 %v4567_v4, %v338_v9  ;;  %v367_v21 = vadd.f32 %v4567_v4, %v345_v11  ;;  %v347_v22 = vmul.f32 %v4557_v3, %v325_v17  ;;  %v368_v23 = vadd.f32 %v4567_v4, %v346_v14  ;;  %v319_v27 = vld [vmem:[%s4572_s22 + $0x20] sm:$0xff]  ;;  %v320_v28 = vld [vmem:[%s4572_s22 + $0x28] sm:$0xff]  ;;  %v321_v39 = vld [vmem:[%s4572_s22 + $0x30] sm:$0xff]  ;;  %285 = vst.msk [vmem:[#allocation2 + $0x8] sm:$0x1] %vm284_vm3, %v4411_v2  ;;  %p3640_p7 = scmp.le.s32.totalorder %s4393_s21, 0 }
  0x1d   : > { %v361_v24 = vadd.f32 %v4567_v4, %v339_v15  ;;  %v362_v25 = vadd.f32 %v4567_v4, %v340_v16  ;;  %v348_v26 = vmul.f32 %v4557_v3, %v326_v18  ;;  %v375_v29 = vmax.f32 %v359_v19, 0.0  ;;  %v327_v33 = vld [vmem:[%s4572_s22 + $0x60] sm:$0xff]  ;;  %v328_v38 = vld [vmem:[%s4572_s22 + $0x68] sm:$0xff]  ;;  %v322_v44 = vld [vmem:[%s4572_s22 + $0x38] sm:$0xff]  ;;  %291 = vst.msk [vmem:[#allocation2 + $0x20] sm:$0x1] %vm284_vm3, %v4411_v2 }
  0x1e   : > { %v376_v30 = vmax.f32 %v360_v20, 0.0  ;;  %v383_v31 = vmax.f32 %v367_v21, 0.0  ;;  %v369_v32 = vadd.f32 %v4567_v4, %v347_v22  ;;  %v384_v34 = vmax.f32 %v368_v23, 0.0  ;;  %v329_v53 = vld [vmem:[%s4572_s22 + $0x70] sm:$0xff]  ;;  %v330_v54 = vld [vmem:[%s4572_s22 + $0x78] sm:$0xff]  ;;  %s3641_s10 = sadd.s32 (!%p3640_p7), 4294967295, %s3611_s29 }
  0x1f   : > { %v377_v35 = vmax.f32 %v361_v24, 0.0  ;;  %v378_v36 = vmax.f32 %v362_v25, 0.0  ;;  %v370_v37 = vadd.f32 %v4567_v4, %v348_v26  ;;  %v341_v42 = vmul.f32 %v4557_v3, %v319_v27  ;;  %312 = vst.msk [vmem:[#allocation2 + $0x74] sm:$0x1] %vm284_vm3, %v4411_v2  ;;  %288 = vst.msk [vmem:[#allocation2 + $0x14] sm:$0x1] %vm284_vm3, %v4411_v2 }
  0x20   : > { %v391_v40 = vpack.c.bf16 %v376_v30, %v375_v29  ;;  %v385_v41 = vmax.f32 %v369_v32, 0.0  ;;  %v342_v43 = vmul.f32 %v4557_v3, %v320_v28  ;;  %v395_v45 = vpack.c.bf16 %v384_v34, %v383_v31  ;;  %294 = vst.msk [vmem:[#allocation2 + $0x2c] sm:$0x1] %vm284_vm3, %v4411_v2  ;;  %297 = vst.msk [vmem:[#allocation2 + $0x38] sm:$0x1] %vm284_vm3, %v4411_v2  ;;  %s3642_s11 = sshll.u32 (!%p3640_p7), %s3641_s10, 4 }
  0x21   : > { %v392_v46 = vpack.c.bf16 %v378_v36, %v377_v35  ;;  %v386_v47 = vmax.f32 %v370_v37, 0.0  ;;  %v349_v48 = vmul.f32 %v4557_v3, %v327_v33  ;;  %v363_v49 = vadd.f32 %v4567_v4, %v341_v42  ;;  %300 = vst.msk [vmem:[#allocation2 + $0x44] sm:$0x1] %vm284_vm3, %v4411_v2  ;;  %303 = vst.msk [vmem:[#allocation2 + $0x50] sm:$0x1] %vm284_vm3, %v4411_v2  ;;  %s826_s12 = scalar_lea.vmem (!%p3640_p7), %s4552_s16, %s3642_s11 }
  0x22   : > { %3968 = vmatprep.mubr.msk.bf16.mxu0 %vm405_vm2, %v391_v40  ;;  %v364_v50 = vadd.f32 %v4567_v4, %v342_v43  ;;  %v350_v51 = vmul.f32 %v4557_v3, %v328_v38  ;;  %v343_v52 = vmul.f32 %v4557_v3, %v321_v39  ;;  %3976 = vmatprep.mubr.msk.bf16.mxu1 %vm405_vm2, %v395_v45  ;;  %v4653_v17 = vld [vmem:[%s5597_s4] ss:$0 sm:$0xff]  ;;  %vm760_vm4 = vsmask.f32 7938  ;;  %v771_v45 = vld [vmem:[#allocation2 + $0x18] sm:$0xf] }
  0x23   : > { %3969 = vmatmul.mubr.msk.bf16.vlgmr.msra.gmra.mrb[0].mxu0 %vm405_vm2, %v392_v46  ;;  %v396_v55 = vpack.c.bf16 %v386_v47, %v385_v41  ;;  %v371_v56 = vadd.f32 %v4567_v4, %v349_v48  ;;  %v344_v57 = vmul.f32 %v4557_v3, %v322_v44  ;;  %v379_v58 = vmax.f32 %v363_v49, 0.0  ;;  %306 = vst.msk [vmem:[#allocation2 + $0x5c] sm:$0x1] %vm284_vm3, %v4411_v2  ;;  %vm4670_vm7 = vmand %vm281_vm1, %vm760_vm4 }
  0x24   : > { %v380_v59 = vmax.f32 %v364_v50, 0.0  ;;  %v372_v60 = vadd.f32 %v4567_v4, %v350_v51  ;;  %v365_v61 = vadd.f32 %v4567_v4, %v343_v52  ;;  %v351_v0 = vmul.f32 %v4557_v3, %v329_v53  ;;  %309 = vst.msk [vmem:[#allocation2 + $0x68] sm:$0x1] %vm284_vm3, %v4411_v2  ;;  %v762_v53 = vld [vmem:[#allocation2 + $0xc] sm:$0xf] }
  0x25   : > { %3977 = vmatmul.mubr.msk.bf16.vlgmr.msra.gmra.mrb[0].mxu1 %vm405_vm2, %v396_v55  ;;  %v387_v62 = vmax.f32 %v371_v56, 0.0  ;;  %v366_v63 = vadd.f32 %v4567_v4, %v344_v57  ;;  %v352_v5 = vmul.f32 %v4557_v3, %v330_v54  ;;  %vm595_vm5 = vsmask.f32 256 }
  0x26   : > { %v393_v6 = vpack.c.bf16 %v380_v59, %v379_v58  ;;  %v388_v7 = vmax.f32 %v372_v60, 0.0  ;;  %v381_v8 = vmax.f32 %v365_v61, 0.0  ;;  %v373_v10 = vadd.f32 %v4567_v4, %v351_v0  ;;  %vm4696_vm9 = vmand %vm284_vm3, %vm595_vm5 }
  0x27   : > { %v382_v9 = vmax.f32 %v366_v63, 0.0  ;;  %v374_v11 = vadd.f32 %v4567_v4, %v352_v5  ;;  %vm596_vm6 = vsmask.f32 4368  ;;  %vm4413_vm10 = vmmov (!%p3640_p7), 0  }
  0x28   : > { %3972 = vmatprep.mubr.msk.bf16.mxu0 %vm405_vm2, %v393_v6  ;;  %v397_v12 = vpack.c.bf16 %v388_v7, %v387_v62  ;;  %v389_v14 = vmax.f32 %v373_v10, 0.0  ;;  %v799_v10 = vld [vmem:[#allocation2 + $0x48] sm:$0xf]  ;;  %vm4685_vm8 = vmor %vm595_vm5, %vm596_vm6 }
  0x29   : > { %v394_v13 = vpack.c.bf16 %v382_v9, %v381_v8  ;;  %v390_v15 = vmax.f32 %v374_v11, 0.0 }
  0x2a   : > { %3980 = vmatprep.mubr.msk.bf16.mxu1 %vm405_vm2, %v397_v12 }
  0x2b   : > { %3973 = vmatmul.mubr.msk.bf16.gmra.mrb[4].mxu0 %vm405_vm2, %v394_v13  ;;  %v398_v16 = vpack.c.bf16 %v390_v15, %v389_v14 }
  0x2d   : > { %3981 = vmatmul.mubr.msk.bf16.gmra.mrb[4].mxu1 %vm405_vm2, %v398_v16 }
  0xf6   : > { %v3970_v18 = vpop.f32.mrb[0].mxu0 }
  0xf7   : > { %v477_v19 = vadd.f32 %v3970_v18, %v4653_v17  ;;  %v468_v20 = vpop.f32.mrb[1].mxu0 }
  0xf8   : > { %v3978_v21 = vpop.f32.mrb[0].mxu1  ;;  %v469_v22 = vadd.f32 %v4653_v17, %v468_v20  ;;  %v3971_v23 = vpop.f32.mrb[2].mxu0  ;;  %v792_v20 = vld [vmem:[#allocation2 + $0x3c] sm:$0xf] }
  0xf9   : > { %v533_v24 = vmax.f32 %v477_v19, 0.0  ;;  %v509_v25 = vadd.f32 %v3978_v21, %v4653_v17  ;;  %v500_v26 = vpop.f32.mrb[1].mxu1  ;;  %v480_v2 = vadd.f32 %v3971_v23, %v4653_v17  ;;  %v471_v27 = vpop.f32.mrb[3].mxu0  ;;  %v775_v23 = vld [vmem:[#allocation2 + $0x20] sm:$0x1] }
  0xfa   : > { %v531_v28 = vmax.f32 %v469_v22, 0.0  ;;  %v501_v29 = vadd.f32 %v4653_v17, %v500_v26  ;;  %v3979_v30 = vpop.f32.mrb[2].mxu1  ;;  %v4661_v31 = vadd.f32 %v4653_v17, %v471_v27 }
  0xfb   : > { %v3853_v32 = vpack.c.bf16 %v533_v24, %v533_v24  ;;  %v541_v33 = vmax.f32 %v509_v25, 0.0  ;;  %v534_v34 = vmax.f32 %v480_v2, 0.0  ;;  %v512_v35 = vadd.f32 %v3979_v30, %v4653_v17  ;;  %v503_v36 = vpop.f32.mrb[3].mxu1 }
  0xfc   : > { %v3851_v37 = vpack.c.bf16 %v531_v28, %v531_v28  ;;  %v539_v38 = vmax.f32 %v501_v29, 0.0  ;;  %v532_v39 = vmax.f32 %v4661_v31, 0.0  ;;  %v4666_v43 = vadd.f32 %v4653_v17, %v503_v36 }
  0xfd   : > { %v616_v40 = vshrl.u32 %v3853_v32, 16  ;;  %v3861_v41 = vpack.c.bf16 %v541_v33, %v541_v33  ;;  %v3854_v42 = vpack.c.bf16 %v534_v34, %v534_v34  ;;  %v619_v44 = vshll.u32 %v3853_v32, 16 }
  0xfe   : > { %v599_v46 = vshrl.u32 %v3851_v37, 16  ;;  %v3859_v47 = vpack.c.bf16 %v539_v38, %v539_v38  ;;  %v542_v48 = vmax.f32 %v512_v35, 0.0  ;;  %v3974_v49 = vpop.f32.mrb[4].mxu0  ;;  %v602_v52 = vshll.u32 %v3851_v37, 16 }
  0xff   : > { %v618_v50 = vrot.slane %v616_v40, 7  ;;  %v684_v51 = vshrl.u32 %v3861_v41, 16  ;;  %v624_v54 = vshrl.u32 %v3854_v42, 16  ;;  %v484_v55 = vpop.f32.mrb[5].mxu0  ;;  %v687_v57 = vshll.u32 %v3861_v41, 16 }
 0x100   : > { %v4674_v58 = vrot.slane %v599_v46, 7  ;;  %v667_v59 = vshrl.u32 %v3859_v47, 16  ;;  %v670_v60 = vshll.u32 %v3859_v47, 16  ;;  %v3982_v61 = vpop.f32.mrb[4].mxu1  ;;  %v4676_v62 = vpop.f32.mrb[6].mxu0  ;;  %v627_v6 = vshll.u32 %v3854_v42, 16 }
 0x101   : > { %v621_v63 = vor.u32 %v619_v44, %v618_v50  ;;  %v686_v0 = vrot.slane %v684_v51, 7  ;;  %v626_v5 = vrot.slane %v624_v54, 7  ;;  %v516_v7 = vpop.f32.mrb[5].mxu1  ;;  %v4678_v8 = vpop.f32.mrb[7].mxu0  ;;  %v622_v9 = vrot.slane %v618_v50, 4 }
 0x102   : > { %v604_v11 = vor.u32 %v602_v52, %v4674_v58  ;;  %v4681_v12 = vrot.slane %v667_v59, 7  ;;  %v3862_v14 = vpack.c.bf16 %v542_v48, %v542_v48  ;;  %v4689_v15 = vpop.f32.mrb[6].mxu1  ;;  %v605_v19 = vrot.slane %v4674_v58, 4  ;;  %v803_v41 = vld [vmem:[#allocation2 + $0x50] sm:$0x1] }
 0x103   : > { %v772_v16 = vsel %vm4670_vm7, %v621_v63, %v771_v45  ;;  %v689_v18 = vor.u32 %v687_v57, %v686_v0  ;;  %v629_v21 = vor.u32 %v627_v6, %v626_v5  ;;  %v4700_v24 = vpop.f32.mrb[7].mxu1  ;;  %v690_v25 = vrot.slane %v686_v0, 4 }
 0x104   : > { %773 = vst [vmem:[#allocation2 + $0x18] sm:$0xf] %v772_v16  ;;  %v763_v26 = vsel %vm4670_vm7, %v604_v11, %v762_v53  ;;  %v672_v2 = vor.u32 %v670_v60, %v4681_v12  ;;  %v631_v27 = vrot.slane %v626_v5, 4  ;;  %v692_v30 = vshrl.u32 %v3862_v14, 16  ;;  %v796_v5 = vld [vmem:[#allocation2 + $0x44] sm:$0x1] }
 0x105   : > { %v800_v28 = vsel %vm4670_vm7, %v689_v18, %v799_v10  ;;  %764 = vst [vmem:[#allocation2 + $0xc] sm:$0xf] %v763_v26  ;;  %v630_v29 = vsel %vm4685_vm8, %v622_v9, %v629_v21  ;;  %v695_v31 = vshll.u32 %v3862_v14, 16  ;;  %v3852_v34 = vpack.c.bf16 %v532_v39, %v532_v39  ;;  %v813_v26 = vld [vmem:[#allocation2 + $0x60] sm:$0xf] }
 0x106   : > { %801 = vst [vmem:[#allocation2 + $0x48] sm:$0xf] %v800_v28  ;;  %v793_v32 = vsel %vm4670_vm7, %v672_v2, %v792_v20  ;;  %774 = vst.msk [vmem:[#allocation2 + $0x1c] sm:$0xf] %vm281_vm1, %v630_v29  ;;  %v776_v33 = vsel %vm4696_vm9, %v631_v27, %v775_v23  ;;  %v540_v35 = vmax.f32 %v4666_v43, 0.0  ;;  %v694_v36 = vrot.slane %v692_v30, 7 }
 0x107   : > { %794 = vst [vmem:[#allocation2 + $0x3c] sm:$0xf] %v793_v32  ;;  %777 = vst [vmem:[#allocation2 + $0x20] sm:$0x1] %v776_v33  ;;  %v493_v37 = vadd.f32 %v3974_v49, %v4653_v17  ;;  %v525_v38 = vadd.f32 %v3982_v61, %v4653_v17  ;;  %v485_v40 = vadd.f32 %v4653_v17, %v484_v55  ;;  %v607_v42 = vshrl.u32 %v3852_v34, 16 }
 0x108   : > { %v610_v44 = vshll.u32 %v3852_v34, 16  ;;  %v3860_v45 = vpack.c.bf16 %v540_v35, %v540_v35  ;;  %v517_v46 = vadd.f32 %v4653_v17, %v516_v7  ;;  %v697_v47 = vor.u32 %v695_v31, %v694_v36  ;;  %v768_v55 = vld [vmem:[#allocation2 + $0x14] sm:$0x1] }
 0x109   : > { %v699_v48 = vrot.slane %v694_v36, 4  ;;  %v537_v39 = vmax.f32 %v493_v37, 0.0  ;;  %v545_v50 = vmax.f32 %v525_v38, 0.0  ;;  %v609_v43 = vrot.slane %v607_v42, 7  ;;  %v778_v36 = vld [vmem:[#allocation2 + $0x24] sm:$0xf] }
 0x10a   : > { %v675_v51 = vshrl.u32 %v3860_v45, 16  ;;  %v678_v52 = vshll.u32 %v3860_v45, 16  ;;  %v535_v53 = vmax.f32 %v485_v40, 0.0  ;;  %v698_v49 = vsel %vm4685_vm8, %v690_v25, %v697_v47  ;;  %v785_v25 = vld [vmem:[#allocation2 + $0x30] sm:$0xf] }
 0x10b   : > { %v804_v54 = vsel %vm4696_vm9, %v699_v48, %v803_v41  ;;  %v3857_v57 = vpack.c.bf16 %v537_v39, %v537_v39  ;;  %v3865_v58 = vpack.c.bf16 %v545_v50, %v545_v50  ;;  %802 = vst.msk [vmem:[#allocation2 + $0x4c] sm:$0xf] %vm281_vm1, %v698_v49  ;;  %v612_v59 = vor.u32 %v610_v44, %v609_v43  ;;  %v806_v39 = vld [vmem:[#allocation2 + $0x54] sm:$0xf] }
 0x10c   : > { %805 = vst [vmem:[#allocation2 + $0x50] sm:$0x1] %v804_v54  ;;  %v614_v60 = vrot.slane %v609_v43, 4  ;;  %v677_v61 = vrot.slane %v675_v51, 7  ;;  %v3855_v63 = vpack.c.bf16 %v535_v53, %v535_v53  ;;  %v673_v0 = vrot.slane %v4681_v12, 4 }
 0x10d   : > { %v650_v6 = vshrl.u32 %v3857_v57, 16  ;;  %v653_v7 = vshll.u32 %v3857_v57, 16  ;;  %v718_v9 = vshrl.u32 %v3865_v58, 16  ;;  %v613_v10 = vsel %vm4685_vm8, %v605_v19, %v612_v59 }
 0x10e   : > { %v769_v11 = vsel %vm4696_vm9, %v614_v60, %v768_v55  ;;  %v680_v14 = vor.u32 %v678_v52, %v677_v61  ;;  %v682_v16 = vrot.slane %v677_v61, 4  ;;  %765 = vst.msk [vmem:[#allocation2 + $0x10] sm:$0xf] %vm281_vm1, %v613_v10  ;;  %v721_v12 = vshll.u32 %v3865_v58, 16  ;;  %v789_v60 = vld [vmem:[#allocation2 + $0x38] sm:$0x1] }
 0x10f   : > { %770 = vst [vmem:[#allocation2 + $0x14] sm:$0x1] %v769_v11  ;;  %v4730_v18 = vrot.slane %v650_v6, 7  ;;  %v4732_v20 = vrot.slane %v718_v9, 7  ;;  %v633_v21 = vshrl.u32 %v3855_v63, 16  ;;  %v543_v2 = vmax.f32 %v517_v46, 0.0 }
 0x110   : > { %v681_v23 = vsel %vm4685_vm8, %v673_v0, %v680_v14  ;;  %v797_v19 = vsel %vm4696_vm9, %v682_v16, %v796_v5  ;;  %v496_v27 = vadd.f32 %v4676_v62, %v4653_v17  ;;  %v636_v30 = vshll.u32 %v3855_v63, 16  ;;  %v817_v10 = vld [vmem:[#allocation2 + $0x68] sm:$0x1] }
 0x111   : > { %795 = vst.msk [vmem:[#allocation2 + $0x40] sm:$0xf] %vm281_vm1, %v681_v23  ;;  %798 = vst [vmem:[#allocation2 + $0x44] sm:$0x1] %v797_v19  ;;  %v655_v28 = vor.u32 %v653_v7, %v4730_v18  ;;  %v723_v29 = vor.u32 %v721_v12, %v4732_v20  ;;  %v4743_v31 = vrot.slane %v633_v21, 7  ;;  %v3863_v32 = vpack.c.bf16 %v543_v2, %v543_v2 }
 0x112   : > { %v538_v33 = vmax.f32 %v496_v27, 0.0  ;;  %v528_v34 = vadd.f32 %v4689_v15, %v4653_v17  ;;  %v488_v37 = vadd.f32 %v4653_v17, %v4678_v8  ;;  %v520_v38 = vadd.f32 %v4653_v17, %v4700_v24  ;;  %v782_v23 = vld [vmem:[#allocation2 + $0x2c] sm:$0x1]  ;;  %v810_v19 = vld [vmem:[#allocation2 + $0x5c] sm:$0x1] }
 0x113   : > { %v786_v35 = vsel %vm4670_vm7, %v655_v28, %v785_v25  ;;  %v814_v62 = vsel %vm4670_vm7, %v723_v29, %v813_v26  ;;  %v638_v40 = vor.u32 %v636_v30, %v4743_v31  ;;  %v701_v41 = vshrl.u32 %v3863_v32, 16 }
 0x114   : > { %787 = vst [vmem:[#allocation2 + $0x30] sm:$0xf] %v786_v35  ;;  %815 = vst [vmem:[#allocation2 + $0x60] sm:$0xf] %v814_v62  ;;  %v3858_v42 = vpack.c.bf16 %v538_v33, %v538_v33  ;;  %v546_v15 = vmax.f32 %v528_v34, 0.0  ;;  %v536_v44 = vmax.f32 %v488_v37, 0.0 }
 0x115   : > { %v544_v45 = vmax.f32 %v520_v38, 0.0  ;;  %v779_v46 = vsel %vm4670_vm7, %v638_v40, %v778_v36  ;;  %v703_v47 = vrot.slane %v701_v41, 7  ;;  %v704_v48 = vshll.u32 %v3863_v32, 16  ;;  %v827_v35 = vld [vmem:[%s826_s12] sm:$0xff] (!%p3640_p7)  ;;  %v828_v62 = vld [vmem:[%s826_s12 + $0x8] sm:$0xff] (!%p3640_p7) }
 0x116   : > { %780 = vst [vmem:[#allocation2 + $0x24] sm:$0xf] %v779_v46  ;;  %v658_v8 = vshrl.u32 %v3858_v42, 16  ;;  %v3866_v50 = vpack.c.bf16 %v546_v15, %v546_v15  ;;  %v3856_v43 = vpack.c.bf16 %v536_v44, %v536_v44  ;;  %v656_v24 = vrot.slane %v4730_v18, 4 }
 0x117   : > { %v724_v51 = vrot.slane %v4732_v20, 4  ;;  %v706_v52 = vor.u32 %v704_v48, %v703_v47  ;;  %v3864_v53 = vpack.c.bf16 %v544_v45, %v544_v45  ;;  %v661_v54 = vshll.u32 %v3858_v42, 16 }
 0x118   : > { %v660_v49 = vrot.slane %v658_v8, 7  ;;  %v726_v55 = vshrl.u32 %v3866_v50, 16  ;;  %v641_v57 = vshrl.u32 %v3856_v43, 16  ;;  %v639_v58 = vrot.slane %v4743_v31, 4 }
 0x119   : > { %v807_v59 = vsel %vm4670_vm7, %v706_v52, %v806_v39  ;;  %v729_v61 = vshll.u32 %v3866_v50, 16  ;;  %v709_v63 = vshrl.u32 %v3864_v53, 16  ;;  %v707_v9 = vrot.slane %v703_v47, 4 }
 0x11a   : > { %808 = vst [vmem:[#allocation2 + $0x54] sm:$0xf] %v807_v59  ;;  %v663_v0 = vor.u32 %v661_v54, %v660_v49  ;;  %v665_v5 = vrot.slane %v660_v49, 4  ;;  %v728_v6 = vrot.slane %v726_v55, 7  ;;  %v643_v7 = vrot.slane %v641_v57, 7 }
 0x11b   : > { %v644_v11 = vshll.u32 %v3856_v43, 16  ;;  %v711_v14 = vrot.slane %v709_v63, 7  ;;  %v712_v16 = vshll.u32 %v3864_v53, 16  ;;  %823 = sbr.rel (%p3640_p7) target bundleno = 522 (0x20a), region = 48  ;;  %v4412_v34 = vmov (!%p3640_p7), 0.0  }
 0x11c   : > { %v664_v18 = vsel %vm4685_vm8, %v656_v24, %v663_v0  ;;  %v790_v20 = vsel %vm4696_vm9, %v665_v5, %v789_v60  ;;  %v731_v12 = vor.u32 %v729_v61, %v728_v6  ;;  %v733_v21 = vrot.slane %v728_v6, 4  ;;  %3984 = vmatprep.subr.bf16.mxu0 (!%p3640_p7), %v4412_v34  ;;  %3986 = vmatprep.mubr.msk.bf16.mxu0 (!%p3640_p7), %vm4413_vm10, %v4412_v34  ;;  %v908_v54 = vld [vmem:[#allocation2] sm:$0xf] (!%p3640_p7)  ;;  %v912_v59 = vld [vmem:[#allocation2 + $0x8] sm:$0x1] (!%p3640_p7) }
 0x11d   : > { %788 = vst.msk [vmem:[#allocation2 + $0x34] sm:$0xf] %vm281_vm1, %v664_v18  ;;  %791 = vst [vmem:[#allocation2 + $0x38] sm:$0x1] %v790_v20  ;;  %v646_v25 = vor.u32 %v644_v11, %v643_v7  ;;  %v648_v26 = vrot.slane %v643_v7, 4  ;;  %v714_v2 = vor.u32 %v712_v16, %v711_v14  ;;  %v716_v27 = vrot.slane %v711_v14, 4  ;;  %3985 = vmatpush3.bf16.msra.mxu0 (!%p3640_p7), %v4493_v1 }
 0x11e   : > { %v732_v28 = vsel %vm4685_vm8, %v724_v51, %v731_v12  ;;  %v818_v29 = vsel %vm4696_vm9, %v733_v21, %v817_v10  ;;  %v829_v36 = vmul.f32 (!%p3640_p7), %v4557_v3, %v827_v35  ;;  %v830_v37 = vmul.f32 (!%p3640_p7), %v4557_v3, %v828_v62 }
 0x11f   : > { %816 = vst.msk [vmem:[#allocation2 + $0x64] sm:$0xf] %vm281_vm1, %v732_v28  ;;  %819 = vst [vmem:[#allocation2 + $0x68] sm:$0x1] %v818_v29  ;;  %v647_v30 = vsel %vm4685_vm8, %v639_v58, %v646_v25  ;;  %v783_v31 = vsel %vm4696_vm9, %v648_v26, %v782_v23  ;;  %v715_v32 = vsel %vm4685_vm8, %v707_v9, %v714_v2 }
 0x120   : > { %v811_v33 = vsel %vm4696_vm9, %v716_v27, %v810_v19  ;;  %781 = vst.msk [vmem:[#allocation2 + $0x28] sm:$0xf] %vm281_vm1, %v647_v30  ;;  %784 = vst [vmem:[#allocation2 + $0x2c] sm:$0x1] %v783_v31  ;;  %v831_v38 = vadd.f32 (!%p3640_p7), %v4567_v4, %v829_v36  ;;  %v832_v40 = vadd.f32 (!%p3640_p7), %v4567_v4, %v830_v37 }
 0x121   : > { %809 = vst.msk [vmem:[#allocation2 + $0x58] sm:$0xf] %vm281_vm1, %v715_v32  ;;  %812 = vst [vmem:[#allocation2 + $0x5c] sm:$0x1] %v811_v33 }
 0x122   : > { %v833_v41 = vmax.f32 %v831_v38, 0.0  ;;  %v834_v42 = vmax.f32 %v832_v40, 0.0 }
 0x124   : > { %v835_v15 = vpack.c.bf16 %v834_v42, %v833_v41 }
 0x126   : > { %3987 = vmatmul.mubr.msk.bf16.vlgmr.msra.gmra.mrb[0].mxu0 %vm405_vm2, %v835_v15 }
 0x1f9   : > { %v873_v44 = vpop.f32.mrb[0].mxu0 }
 0x1fa   : > { %v874_v45 = vadd.f32 %v4653_v17, %v873_v44  ;;  %v3988_v46 = vpop.f32.mrb[1].mxu0 }
 0x1fb   : > { %v876_v47 = vpop.f32.mrb[2].mxu0 }
 0x1fc   : > { %v880_v48 = vmax.f32 %v874_v45, 0.0  ;;  %v877_v39 = vadd.f32 %v4653_v17, %v876_v47  ;;  %v3989_v8 = vpop.f32.mrb[3].mxu0 }
 0x1fe   : > { %v3867_v50 = vpack.c.bf16 %v880_v48, %v880_v48  ;;  %v881_v43 = vmax.f32 %v877_v39, 0.0 }
 0x200   : > { %v889_v24 = vshrl.u32 %v3867_v50, 16  ;;  %v3868_v51 = vpack.c.bf16 %v881_v43, %v881_v43  ;;  %v892_v53 = vshll.u32 %v3867_v50, 16 }
 0x202   : > { %v891_v52 = vrot.slane %v889_v24, 7  ;;  %v897_v49 = vshrl.u32 %v3868_v51, 16  ;;  %v900_v58 = vshll.u32 %v3868_v51, 16 }
 0x204   : > { %v894_v55 = vor.u32 %v892_v53, %v891_v52  ;;  %v899_v57 = vrot.slane %v897_v49, 7  ;;  %v895_v60 = vrot.slane %v891_v52, 4 }
 0x206   : > { %v909_v61 = vsel %vm4670_vm7, %v894_v55, %v908_v54  ;;  %v902_v63 = vor.u32 %v900_v58, %v899_v57  ;;  %v904_v0 = vrot.slane %v899_v57, 4 }
 0x207   : > { %910 = vst [vmem:[#allocation2] sm:$0xf] %v909_v61 }
 0x208   : > { %v903_v5 = vsel %vm4685_vm8, %v895_v60, %v902_v63  ;;  %v913_v6 = vsel %vm4696_vm9, %v904_v0, %v912_v59 }
 0x209   : > { %911 = vst.msk [vmem:[#allocation2 + $0x4] sm:$0xf] %vm281_vm1, %v903_v5  ;;  %914 = vst [vmem:[#allocation2 + $0x8] sm:$0x1] %v913_v6 }
 0x20a PF: > { %p3646_p8 = scmp.ge.s32.totalorder %s4393_s21, 1 }
 0x20b   : > { %v3649_v7 = vld [vmem:[%s4572_s22 + $0x80] sm:$0xff] (!%p3646_p8)  ;;  %v3650_v9 = vld [vmem:[%s4572_s22 + $0x88] sm:$0xff] (!%p3646_p8)  ;;  %v4414_v10 = vmov (!%p3646_p8), 0.0   ;;  %vm4415_vm11 = vmmov (!%p3646_p8), 0   ;;  %v1008_v36 = vld [vmem:[#allocation2 + $0x74] sm:$0x1] (!%p3646_p8) }
 0x20c   : > { %918 = sbr.rel (%p3646_p8) target bundleno = 760 (0x2f8), region = 52  ;;  %3990 = vmatprep.subr.bf16.mxu0 (!%p3646_p8), %v4414_v10  ;;  %3992 = vmatprep.mubr.msk.bf16.mxu0 (!%p3646_p8), %vm4415_vm11, %v4414_v10  ;;  %v924_v11 = vmul.f32 (!%p3646_p8), %v3649_v7, %v4557_v3  ;;  %v925_v14 = vmul.f32 (!%p3646_p8), %v3650_v9, %v4557_v3  ;;  %v1004_v33 = vld [vmem:[#allocation2 + $0x6c] sm:$0xf] (!%p3646_p8) }
 0x20d   : > { %3991 = vmatpush3.bf16.msra.mxu0 (!%p3646_p8), %v4493_v1 }
 0x20e   : > { %v926_v16 = vadd.f32 (!%p3646_p8), %v4567_v4, %v924_v11  ;;  %v927_v18 = vadd.f32 (!%p3646_p8), %v4567_v4, %v925_v14 }
 0x210   : > { %v928_v20 = vmax.f32 (!%p3646_p8), %v926_v16, 0.0  ;;  %v929_v12 = vmax.f32 (!%p3646_p8), %v927_v18, 0.0 }
 0x212   : > { %v930_v21 = vpack.c.bf16 (!%p3646_p8), %v929_v12, %v928_v20 }
 0x214   : > { %3993 = vmatmul.mubr.msk.bf16.vlgmr.msra.gmra.mrb[0].mxu0 %vm405_vm2, %v930_v21 }
 0x2e7   : > { %v968_v23 = vpop.f32.mrb[0].mxu0 }
 0x2e8   : > { %v969_v19 = vadd.f32 %v4653_v17, %v968_v23  ;;  %v3994_v25 = vpop.f32.mrb[1].mxu0 }
 0x2e9   : > { %v971_v26 = vpop.f32.mrb[2].mxu0 }
 0x2ea   : > { %v975_v2 = vmax.f32 %v969_v19, 0.0  ;;  %v972_v27 = vadd.f32 %v4653_v17, %v971_v26  ;;  %v3995_v3 = vpop.f32.mrb[3].mxu0 }
 0x2ec   : > { %v3870_v28 = vpack.c.bf16 %v975_v2, %v975_v2  ;;  %v976_v1 = vmax.f32 %v972_v27, 0.0 }
 0x2ee   : > { %v984_v29 = vshrl.u32 %v3870_v28, 16  ;;  %v3871_v30 = vpack.c.bf16 %v976_v1, %v976_v1  ;;  %v987_v4 = vshll.u32 %v3870_v28, 16 }
 0x2f0   : > { %v986_v31 = vrot.slane %v984_v29, 7  ;;  %v992_v32 = vshrl.u32 %v3871_v30, 16  ;;  %v995_v62 = vshll.u32 %v3871_v30, 16 }
 0x2f2   : > { %v989_v34 = vor.u32 %v987_v4, %v986_v31  ;;  %v994_v35 = vrot.slane %v992_v32, 7  ;;  %v990_v37 = vrot.slane %v986_v31, 4 }
 0x2f4   : > { %v1005_v38 = vsel %vm4670_vm7, %v989_v34, %v1004_v33  ;;  %v997_v40 = vor.u32 %v995_v62, %v994_v35  ;;  %v999_v41 = vrot.slane %v994_v35, 4 }
 0x2f5   : > { %1006 = vst [vmem:[#allocation2 + $0x6c] sm:$0xf] %v1005_v38 }
 0x2f6   : > { %v998_v17 = vsel %vm4685_vm8, %v990_v37, %v997_v40  ;;  %v1009_v42 = vsel %vm4696_vm9, %v999_v41, %v1008_v36 }
 0x2f7   : > { %1007 = vst.msk [vmem:[#allocation2 + $0x70] sm:$0xf] %vm281_vm1, %v998_v17  ;;  %1010 = vst [vmem:[#allocation2 + $0x74] sm:$0x1] %v1009_v42 }
 0x2f8 PF: > { %v4337_v15 = vld [vmem:[%s5598_s5 + $0x8] sm:$0xff]   ;;  %v4338_v56 = vld [vmem:[%s5598_s5 + $0x20] sm:$0xff]   ;;  %vm1037_vm12 = vsmask.f32 3328  ;;  %vm1038_vm13 = vsmask.f32 7440 }
 0x2f9   : > { %3996 = vmatprep.subr.bf16.mxu1 %v4337_v15  ;;  %v4826_v44 = vld [vmem:[#allocation2] sm:$0xf]  ;;  %v4828_v13 = vld [vmem:[#allocation2 + $0x4] sm:$0xf]  ;;  %v4830_v45 = vld [vmem:[#allocation2 + $0x8] sm:$0x1]  ;;  %4068 = vmatprep.subr.bf16.mxu0 %v4338_v56 }
 0x2fa   : > { %3997 = vmatpush3.bf16.msra.mxu1 %v4337_v15  ;;  %v1041_v22 = vshrl.u32 %v4826_v44, 16  ;;  %v1044_v46 = vshll.u32 %v4826_v44, 16  ;;  %4069 = vmatpush3.bf16.msra.mxu0 %v4338_v56  ;;  %v1050_v47 = vshll.u32 %v4828_v13, 16  ;;  %v1054_v48 = vshrl.u32 %v4828_v13, 16  ;;  %v4840_v43 = vld [vmem:[%s5598_s5] sm:$0xff]   ;;  %v4845_v24 = vld [vmem:[%s5598_s5 + $0x28] sm:$0xff]   ;;  %vm4855_vm14 = vmor %vm1037_vm12, %vm1038_vm13 }
 0x2fb   : > { %v1060_v39 = vshll.u32 %v4830_v45, 16  ;;  %v2009_v49 = vld [vmem:[#allocation2 + $0xc] sm:$0xf]  ;;  %4014 = vmatprep.subr.bf16.mxu1 %v4840_v43  ;;  %v4848_v55 = vld [vmem:[#allocation2 + $0x10] sm:$0xf]  ;;  %4086 = vmatprep.subr.bf16.mxu0 %v4845_v24  ;;  %vm1265_vm15 = vcmask 130048  }
 0x2fc   : > { %v1043_v8 = vrot.slane %v1041_v22, 4  ;;  %v1046_v50 = vrot.slane %v1044_v46, 5  ;;  %v1052_v51 = vrot.slane %v1050_v47, 5  ;;  %v1056_v52 = vrot.slane %v1054_v48, 4  ;;  %v4850_v57 = vld [vmem:[#allocation2 + $0x14] sm:$0x1] }
 0x2fd   : > { %v1062_v53 = vrot.slane %v1060_v39, 5  ;;  %v2034_v58 = vshrl.u32 %v2009_v49, 16  ;;  %v2037_v59 = vshll.u32 %v2009_v49, 16  ;;  %v2043_v63 = vshll.u32 %v4848_v55, 16  ;;  %v4862_v16 = vld [vmem:[#allocation2 + $0xc] sm:$0xf] }
 0x2fe   : > { %v1047_v54 = vor.u32 %v1046_v50, %v1043_v8  ;;  %v1057_v61 = vor.u32 %v1056_v52, %v1052_v51  ;;  %v2047_v0 = vshrl.u32 %v4848_v55, 16  ;;  %v2053_v5 = vshll.u32 %v4850_v57, 16  ;;  %v4866_v21 = vld [vmem:[#allocation2 + $0x10] sm:$0xf]  ;;  %v4868_v23 = vld [vmem:[#allocation2 + $0x14] sm:$0x1] }
 0x2ff   : > { %v2036_v7 = vrot.slane %v2034_v58, 4  ;;  %v2039_v9 = vrot.slane %v2037_v59, 5  ;;  %v2045_v11 = vrot.slane %v2043_v63, 5  ;;  %v1065_v19 = vshrl.u32 %v4862_v16, 16  ;;  %v2012_v30 = vld [vmem:[#allocation2 + $0x18] sm:$0xf] }
 0x300   : > { %v1048_v6 = vrot.slane %v1047_v54, 4  ;;  %v1058_v10 = vrot.slane %v1057_v61, 4  ;;  %v2049_v14 = vrot.slane %v2047_v0, 4  ;;  %v2055_v12 = vrot.slane %v2053_v5, 5  ;;  %v4877_v34 = vld [vmem:[#allocation2 + $0x1c] sm:$0xf] }
 0x301   : > { %v2040_v20 = vor.u32 %v2039_v9, %v2036_v7  ;;  %v1068_v2 = vshll.u32 %v4862_v16, 16  ;;  %v1074_v27 = vshll.u32 %v4866_v21, 16  ;;  %v1067_v1 = vrot.slane %v1065_v19, 4  ;;  %v4884_v38 = vld [vmem:[#allocation2 + $0x20] sm:$0x1] }
 0x302   : > { %v1053_v18 = vsel %vm4855_vm14, %v1048_v6, %v1052_v51  ;;  %v1063_v25 = vsel %vm4855_vm14, %v1058_v10, %v1062_v53  ;;  %v2050_v26 = vor.u32 %v2049_v14, %v2045_v11  ;;  %v1078_v29 = vshrl.u32 %v4866_v21, 16  ;;  %v4891_v50 = vld [vmem:[#allocation2 + $0x18] sm:$0xf]  ;;  %v4895_v54 = vld [vmem:[#allocation2 + $0x1c] sm:$0xf] }
 0x303   : > { %v3656_v3 = vcombine.low %v1053_v18, %v1063_v25  ;;  %v2041_v28 = vrot.slane %v2040_v20, 4  ;;  %v1070_v4 = vrot.slane %v1068_v2, 5  ;;  %v1076_v32 = vrot.slane %v1074_v27, 5  ;;  %v4900_v0 = vld [vmem:[#allocation2 + $0x20] sm:$0x1] }
 0x304   : > { %v2051_v31 = vrot.slane %v2050_v26, 4  ;;  %v1084_v33 = vshll.u32 %v4868_v23, 16  ;;  %v2429_v62 = vrot.slane %v4848_v55, 5  ;;  %v2432_v36 = vrot.slane %v4850_v57, 5  ;;  %v2015_v10 = vld [vmem:[#allocation2 + $0x24] sm:$0xf] }
 0x305   : > { %3998 = vmatprep.mubr.msk.bf16.mxu1 %vm1265_vm15, %v3656_v3  ;;  %v2046_v35 = vsel %vm4855_vm14, %v2041_v28, %v2045_v11  ;;  %v1080_v37 = vrot.slane %v1078_v29, 4  ;;  %v1071_v41 = vor.u32 %v1070_v4, %v1067_v1  ;;  %v2058_v42 = vshrl.u32 %v2012_v30, 16  ;;  %v4918_v27 = vld [vmem:[#allocation2 + $0x28] sm:$0xf]  ;;  %v4921_v29 = vld [vmem:[#allocation2 + $0x2c] sm:$0x1] }
 0x306   : > { %v2056_v40 = vsel %vm4855_vm14, %v2051_v31, %v2055_v12  ;;  %v1086_v17 = vrot.slane %v1084_v33, 5  ;;  %v2061_v22 = vshll.u32 %v2012_v30, 16  ;;  %v2067_v46 = vshll.u32 %v4877_v34, 16  ;;  %v4914_v12 = vld [vmem:[%s5598_s5 + $0x10] sm:$0xff]  }
 0x307   : > { %v3738_v15 = vcombine.low %v2046_v35, %v2056_v40  ;;  %v1081_v56 = vor.u32 %v1080_v37, %v1076_v32  ;;  %v1072_v47 = vrot.slane %v1071_v41, 4  ;;  %v2060_v48 = vrot.slane %v2058_v42, 4  ;;  %v4926_v35 = vld [vmem:[#allocation2 + $0x24] sm:$0xf] }
 0x308   : > { %v2071_v39 = vshrl.u32 %v4877_v34, 16  ;;  %v2077_v8 = vshll.u32 %v4884_v38, 16  ;;  %v2063_v52 = vrot.slane %v2061_v22, 5  ;;  %v2069_v53 = vrot.slane %v2067_v46, 5  ;;  %v4933_v22 = vld [vmem:[#allocation2 + $0x28] sm:$0xf] }
 0x309   : > { %4070 = vmatprep.mubr.msk.bf16.mxu0 %vm1265_vm15, %v3738_v15  ;;  %v1082_v51 = vrot.slane %v1081_v56, 4  ;;  %v2436_v49 = vrot.slane %v4877_v34, 5  ;;  %v1077_v58 = vsel %vm4855_vm14, %v1072_v47, %v1076_v32  ;;  %v2439_v63 = vrot.slane %v4884_v38, 5  ;;  %v4938_v46 = vld [vmem:[%s5598_s5 + $0x30] sm:$0xff]   ;;  %v5046_v34 = vld [vmem:[%s5598_s5 + $0x38] sm:$0xff]  }
 0x30a   : > { %v2073_v59 = vrot.slane %v2071_v39, 4  ;;  %v2079_v61 = vrot.slane %v2077_v8, 5  ;;  %v2064_v6 = vor.u32 %v2063_v52, %v2060_v48  ;;  %v1089_v9 = vshrl.u32 %v4891_v50, 16  ;;  %v5038_v38 = vld [vmem:[#allocation2 + $0x54] sm:$0xf] }
 0x30b   : > { %v1087_v5 = vsel %vm4855_vm14, %v1082_v51, %v1086_v17  ;;  %v4906_v7 = vrot.slane %v2436_v49, 4  ;;  %v1092_v18 = vshll.u32 %v4891_v50, 16  ;;  %v1098_v20 = vshll.u32 %v4895_v54, 16 }
 0x30c   : > { %v3657_v11 = vcombine.low %v1077_v58, %v1087_v5  ;;  %v2074_v14 = vor.u32 %v2073_v59, %v2069_v53  ;;  %v2065_v19 = vrot.slane %v2064_v6, 4  ;;  %v1091_v25 = vrot.slane %v1089_v9, 4  ;;  %v4943_v58 = vld [vmem:[#allocation2 + $0x2c] sm:$0x1] }
 0x30d   : > { %v1102_v26 = vshrl.u32 %v4895_v54, 16  ;;  %v1108_v2 = vshll.u32 %v4900_v0, 16  ;;  %v1094_v28 = vrot.slane %v1092_v18, 5  ;;  %v1100_v1 = vrot.slane %v1098_v20, 5 }
 0x30e   : > { %3999 = vmatmul.mubr.msk.bf16.vlgmr.msra.gmra.mrb[0].mxu1 %vm1265_vm15, %v3657_v11  ;;  %v2075_v3 = vrot.slane %v2074_v14, 4  ;;  %v2082_v30 = vshrl.u32 %v2015_v10, 16  ;;  %v2070_v31 = vsel %vm4855_vm14, %v2065_v19, %v2069_v53  ;;  %v2085_v33 = vshll.u32 %v2015_v10, 16  ;;  %v2018_v10 = vld [vmem:[#allocation2 + $0x30] sm:$0xf] }
 0x30f   : > { %4015 = vmatpush3.bf16.msra.mxu1 %v4840_v43  ;;  %v1104_v4 = vrot.slane %v1102_v26, 4  ;;  %v1110_v32 = vrot.slane %v1108_v2, 5  ;;  %v1095_v40 = vor.u32 %v1094_v28, %v1091_v25  ;;  %v2091_v17 = vshll.u32 %v4918_v27, 16  ;;  %v4952_v19 = vld [vmem:[#allocation2 + $0x34] sm:$0xf] }
 0x310   : > { %v2080_v37 = vsel %vm4855_vm14, %v2075_v3, %v2079_v61  ;;  %v2084_v41 = vrot.slane %v2082_v30, 4  ;;  %4032 = vmatprep.subr.bf16.mxu1 %v4914_v12  ;;  %v2087_v43 = vrot.slane %v2085_v33, 5  ;;  %v2095_v56 = vshrl.u32 %v4918_v27, 16  ;;  %v4959_v30 = vld [vmem:[#allocation2 + $0x38] sm:$0x1] }
 0x311   : > { %v3739_v42 = vcombine.low %v2070_v31, %v2080_v37  ;;  %v1105_v15 = vor.u32 %v1104_v4, %v1100_v1  ;;  %v1096_v47 = vrot.slane %v1095_v40, 4  ;;  %v2093_v48 = vrot.slane %v2091_v17, 5  ;;  %v4963_v40 = vld [vmem:[#allocation2 + $0x30] sm:$0xf] }
 0x312   : > { %v2101_v39 = vshll.u32 %v4921_v29, 16  ;;  %v1113_v8 = vshrl.u32 %v4926_v35, 16  ;;  %v2088_v52 = vor.u32 %v2087_v43, %v2084_v41  ;;  %v2097_v53 = vrot.slane %v2095_v56, 4  ;;  %v4968_v43 = vld [vmem:[#allocation2 + $0x34] sm:$0xf] }
 0x313   : > { %4071 = vmatmul.mubr.msk.bf16.vlgmr.msra.gmra.mrb[0].mxu0 %vm1265_vm15, %v3739_v42  ;;  %v1106_v51 = vrot.slane %v1105_v15, 4  ;;  %v1116_v59 = vshll.u32 %v4926_v35, 16  ;;  %v1101_v61 = vsel %vm4855_vm14, %v1096_v47, %v1100_v1  ;;  %v1122_v9 = vshll.u32 %v4933_v22, 16 }
 0x314   : > { %4087 = vmatpush3.bf16.msra.mxu0 %v4845_v24  ;;  %v2103_v5 = vrot.slane %v2101_v39, 5  ;;  %v1115_v6 = vrot.slane %v1113_v8, 4  ;;  %vm1578_vm0 = vcmask 1042432   ;;  %vm1579_vm1 = vcmask 1046532  }
 0x315   : > { %v1111_v11 = vsel %vm4855_vm14, %v1106_v51, %v1110_v32  ;;  %v2089_v14 = vrot.slane %v2088_v52, 4  ;;  %v2098_v18 = vor.u32 %v2097_v53, %v2093_v48  ;;  %v1118_v20 = vrot.slane %v1116_v59, 5  ;;  %4104 = vmatprep.subr.bf16.mxu0 %v4938_v46  ;;  %vm4987_vm2 = vmor %vm1578_vm0, %vm1579_vm1 }
 0x316   : > { %v3658_v24 = vcombine.low %v1101_v61, %v1111_v11  ;;  %v1124_v25 = vrot.slane %v1122_v9, 5  ;;  %v1126_v26 = vshrl.u32 %v4933_v22, 16  ;;  %v1132_v2 = vshll.u32 %v4943_v58, 16 }
 0x317   : > { %v2094_v3 = vsel %vm4855_vm14, %v2089_v14, %v2093_v48  ;;  %v2099_v28 = vrot.slane %v2098_v18, 4  ;;  %v1119_v1 = vor.u32 %v1118_v20, %v1115_v6  ;;  %v2106_v31 = vshrl.u32 %v2018_v10, 16  ;;  %v2395_v20 = vld [vmem:[#allocation2 + $0xc] sm:$0xe] }
 0x318   : > { %4002 = vmatprep.mubr.msk.bf16.mxu1 %vm1265_vm15, %v3658_v24  ;;  %v1128_v4 = vrot.slane %v1126_v26, 4  ;;  %v1134_v32 = vrot.slane %v1132_v2, 5  ;;  %v2109_v33 = vshll.u32 %v2018_v10, 16  ;;  %v2115_v37 = vshll.u32 %v4952_v19, 16 }
 0x319   : > { %v2104_v41 = vsel %vm4855_vm14, %v2099_v28, %v2103_v5  ;;  %v1120_v17 = vrot.slane %v1119_v1, 4  ;;  %v2108_v42 = vrot.slane %v2106_v31, 4  ;;  %v2119_v15 = vshrl.u32 %v4952_v19, 16  ;;  %v4975_v5 = vld [vmem:[#allocation2 + $0x38] sm:$0x1] }
 0x31a   : > { %v3740_v56 = vcombine.low %v2094_v3, %v2104_v41  ;;  %v1129_v47 = vor.u32 %v1128_v4, %v1124_v25  ;;  %v2111_v48 = vrot.slane %v2109_v33, 5  ;;  %v2117_v39 = vrot.slane %v2115_v37, 5  ;;  %v4982_v3 = vld [vmem:[#allocation2 + $0x3c] sm:$0xf] }
 0x31b   : > { %v1125_v8 = vsel %vm4855_vm14, %v1120_v17, %v1124_v25  ;;  %v2121_v51 = vrot.slane %v2119_v15, 4  ;;  %v2125_v52 = vshll.u32 %v4959_v30, 16  ;;  %v1137_v53 = vshrl.u32 %v4963_v40, 16 }
 0x31c   : > { %4074 = vmatprep.mubr.msk.bf16.mxu0 %vm1265_vm15, %v3740_v56  ;;  %v1130_v59 = vrot.slane %v1129_v47, 4  ;;  %v2112_v61 = vor.u32 %v2111_v48, %v2108_v42  ;;  %v1140_v6 = vshll.u32 %v4963_v40, 16  ;;  %v1146_v9 = vshll.u32 %v4968_v43, 16  ;;  %v4998_v47 = vld [vmem:[#allocation2 + $0x40] sm:$0xf] }
 0x31d   : > { %v2122_v10 = vor.u32 %v2121_v51, %v2117_v39  ;;  %v2127_v11 = vrot.slane %v2125_v52, 5  ;;  %v1139_v14 = vrot.slane %v1137_v53, 4  ;;  %v1150_v18 = vshrl.u32 %v4968_v43, 16  ;;  %v5000_v48 = vld [vmem:[#allocation2 + $0x44] sm:$0x1] }
 0x31e   : > { %v1135_v24 = vsel %vm4855_vm14, %v1130_v59, %v1134_v32  ;;  %v2113_v25 = vrot.slane %v2112_v61, 4  ;;  %v1142_v26 = vrot.slane %v1140_v6, 5  ;;  %v1148_v2 = vrot.slane %v1146_v9, 5  ;;  %v2396_v59 = vld [vmem:[#allocation2 + $0x18] sm:$0xe] }
 0x31f   : > { %v3659_v28 = vcombine.low %v1125_v8, %v1135_v24  ;;  %v2123_v1 = vrot.slane %v2122_v10, 4  ;;  %v1152_v31 = vrot.slane %v1150_v18, 4  ;;  %v1156_v4 = vshll.u32 %v4975_v5, 16  ;;  %v5011_v61 = vld [vmem:[#allocation2 + $0x48] sm:$0xf] }
 0x320   : > { %v2118_v37 = vsel %vm4855_vm14, %v2113_v25, %v2117_v39  ;;  %v1143_v32 = vor.u32 %v1142_v26, %v1139_v14  ;;  %v3755_v41 = vrot.slane %v2395_v20, 9  ;;  %v2431_v17 = vrot.slane %v2429_v62, 4  ;;  %v5014_v14 = vld [vmem:[#allocation2 + $0x4c] sm:$0xf]  ;;  %v5022_v18 = vld [vmem:[#allocation2 + $0x50] sm:$0x1] }
 0x321   : > { %4003 = vmatmul.mubr.msk.bf16.gmra.mrb[4].mxu1 %vm1265_vm15, %v3659_v28  ;;  %v2128_v42 = vsel %vm4855_vm14, %v2123_v1, %v2127_v11  ;;  %v1153_v15 = vor.u32 %v1152_v31, %v1148_v2  ;;  %v1158_v56 = vrot.slane %v1156_v4, 5  ;;  %v1161_v8 = vshrl.u32 %v4982_v3, 16 }
 0x322   : > { %v3741_v51 = vcombine.low %v2118_v37, %v2128_v42  ;;  %v1144_v39 = vrot.slane %v1143_v32, 4  ;;  %v2430_v52 = vsel %vm4987_vm2, %v3755_v41, %v2429_v62  ;;  %v2433_v53 = vsel %vm4987_vm2, %v2431_v17, %v2432_v36 }
 0x323   : > { %v1154_v6 = vrot.slane %v1153_v15, 4  ;;  %v3765_v9 = vcombine.low %v2430_v52, %v2433_v53  ;;  %v1163_v10 = vrot.slane %v1161_v8, 4  ;;  %v1164_v11 = vshll.u32 %v4982_v3, 16 }
 0x324   : > { %4075 = vmatmul.mubr.msk.bf16.gmra.mrb[4].mxu0 %vm1265_vm15, %v3741_v51  ;;  %v1149_v55 = vsel %vm4855_vm14, %v1144_v39, %v1148_v2  ;;  %v1170_v57 = vshll.u32 %v4998_v47, 16  ;;  %v1174_v62 = vshrl.u32 %v4998_v47, 16  ;;  %v1180_v36 = vshll.u32 %v5000_v48, 16  ;;  %v2397_v2 = vld [vmem:[#allocation2 + $0x24] sm:$0xe] }
 0x325   : > { %v1159_v20 = vsel %vm4855_vm14, %v1154_v6, %v1158_v56  ;;  %4088 = vmatprep.mubr.msk.bf16.mxu0 %vm1265_vm15, %v3765_v9  ;;  %v1166_v24 = vrot.slane %v1164_v11, 5  ;;  %v3756_v25 = vrot.slane %v2396_v59, 9  ;;  %v2440_v26 = vsel %vm4987_vm2, %v4906_v7, %v2439_v63  ;;  %v5049_v39 = vld [vmem:[#allocation2 + $0x58] sm:$0xf] }
 0x326   : > { %v3660_v28 = vcombine.low %v1149_v55, %v1159_v20  ;;  %v1172_v1 = vrot.slane %v1170_v57, 5  ;;  %v1176_v31 = vrot.slane %v1174_v62, 4  ;;  %v1182_v4 = vrot.slane %v1180_v36, 5  ;;  %v5054_v57 = vld [vmem:[#allocation2 + $0x5c] sm:$0x1] }
 0x327   : > { %v1167_v37 = vor.u32 %v1166_v24, %v1163_v10  ;;  %v2437_v32 = vsel %vm4987_vm2, %v3756_v25, %v2436_v49  ;;  %v1185_v41 = vshrl.u32 %v5011_v61, 16  ;;  %v1188_v17 = vshll.u32 %v5011_v61, 16 }
 0x328   : > { %4006 = vmatprep.mubr.msk.bf16.mxu1 %vm1265_vm15, %v3660_v28  ;;  %v1177_v63 = vor.u32 %v1176_v31, %v1172_v1  ;;  %v3766_v7 = vcombine.low %v2437_v32, %v2440_v26  ;;  %v1194_v42 = vshll.u32 %v5014_v14, 16  ;;  %v1198_v15 = vshrl.u32 %v5014_v14, 16  ;;  %v2398_v28 = vld [vmem:[#allocation2 + $0x30] sm:$0xe]  ;;  %v5066_v32 = vld [vmem:[#allocation2 + $0x40] sm:$0xf] }
 0x329   : > { %v1168_v49 = vrot.slane %v1167_v37, 4  ;;  %v1187_v56 = vrot.slane %v1185_v41, 4  ;;  %v1190_v8 = vrot.slane %v1188_v17, 5  ;;  %v1204_v51 = vshll.u32 %v5022_v18, 16 }
 0x32a   : > { %v1178_v52 = vrot.slane %v1177_v63, 4  ;;  %v1196_v53 = vrot.slane %v1194_v42, 5  ;;  %v1200_v59 = vrot.slane %v1198_v15, 4  ;;  %v3757_v6 = vrot.slane %v2397_v2, 9 }
 0x32b   : > { %v1173_v9 = vsel %vm4855_vm14, %v1168_v49, %v1172_v1  ;;  %v1191_v10 = vor.u32 %v1190_v8, %v1187_v56  ;;  %v1206_v11 = vrot.slane %v1204_v51, 5  ;;  %v2443_v55 = vrot.slane %v4918_v27, 5 }
 0x32c   : > { %v1183_v62 = vsel %vm4855_vm14, %v1178_v52, %v1182_v4  ;;  %4089 = vmatmul.mubr.msk.bf16.vlgmr.msra.gmra.mrb[0].mxu0 %vm1265_vm15, %v3766_v7  ;;  %v1201_v36 = vor.u32 %v1200_v59, %v1196_v53  ;;  %v2446_v20 = vrot.slane %v4921_v29, 5  ;;  %v1209_v24 = vshrl.u32 %v5038_v38, 16  ;;  %v5068_v29 = vld [vmem:[#allocation2 + $0x44] sm:$0x1]  ;;  %v2399_v7 = vld [vmem:[#allocation2 + $0x3c] sm:$0xe] }
 0x32d   : > { %v3661_v25 = vcombine.low %v1173_v9, %v1183_v62  ;;  %4105 = vmatpush3.bf16.msra.mxu0 %v4938_v46  ;;  %v1192_v26 = vrot.slane %v1191_v10, 4  ;;  %v2444_v2 = vsel %vm4987_vm2, %v3757_v6, %v2443_v55  ;;  %v2445_v27 = vrot.slane %v2443_v55, 4 }
 0x32e   : > { %v1202_v1 = vrot.slane %v1201_v36, 4  ;;  %v1211_v31 = vrot.slane %v1209_v24, 4  ;;  %v1212_v4 = vshll.u32 %v5038_v38, 16  ;;  %v1218_v37 = vshll.u32 %v5049_v39, 16  ;;  %4122 = vmatprep.subr.bf16.mxu0 %v5046_v34 }
 0x32f   : > { %4007 = vmatmul.mubr.msk.bf16.gmra.mrb[8].mxu1 %vm1265_vm15, %v3661_v25  ;;  %v1197_v46 = vsel %vm4855_vm14, %v1192_v26, %v1196_v53  ;;  %v2447_v41 = vsel %vm4987_vm2, %v2445_v27, %v2446_v20  ;;  %v1222_v17 = vshrl.u32 %v5049_v39, 16  ;;  %v1228_v63 = vshll.u32 %v5054_v57, 16 }
 0x330   : > { %v1207_v42 = vsel %vm4855_vm14, %v1202_v1, %v1206_v11  ;;  %v3767_v15 = vcombine.low %v2444_v2, %v2447_v41  ;;  %v1214_v49 = vrot.slane %v1212_v4, 5  ;;  %v1220_v56 = vrot.slane %v1218_v37, 5  ;;  %v2400_v2 = vld [vmem:[#allocation2 + $0x48] sm:$0xe]  ;;  %v5096_v1 = vld [vmem:[#allocation2 + $0x50] sm:$0x1] }
 0x331   : > { %v3662_v8 = vcombine.low %v1197_v46, %v1207_v42  ;;  %v1224_v51 = vrot.slane %v1222_v17, 4  ;;  %v3758_v52 = vrot.slane %v2398_v28, 9  ;;  %v2450_v59 = vrot.slane %v4952_v19, 5  ;;  %v5106_v17 = vld [vmem:[#allocation2 + $0x5c] sm:$0x1] }
 0x332   : > { %4092 = vmatprep.mubr.msk.bf16.mxu0 %vm1265_vm15, %v3767_v15  ;;  %v1215_v53 = vor.u32 %v1214_v49, %v1211_v31  ;;  %v2453_v6 = vrot.slane %v4959_v30, 5  ;;  %v3759_v9 = vrot.slane %v2399_v7, 9  ;;  %v1230_v55 = vrot.slane %v1228_v63, 5  ;;  %v5090_v30 = vld [vmem:[#allocation2 + $0x4c] sm:$0xf] }
 0x333   : > { %4010 = vmatprep.mubr.msk.bf16.mxu1 %vm1265_vm15, %v3662_v8  ;;  %v1225_v10 = vor.u32 %v1224_v51, %v1220_v56  ;;  %v2457_v11 = vrot.slane %v5066_v32, 5  ;;  %v2460_v62 = vrot.slane %v5068_v29, 5  ;;  %v2451_v20 = vsel %vm4987_vm2, %v3758_v52, %v2450_v59  ;;  %v5098_v31 = vld [vmem:[#allocation2 + $0x58] sm:$0xf]  ;;  %v2401_v63 = vld [vmem:[#allocation2 + $0x54] sm:$0xe] }
 0x334   : > { %v1216_v36 = vrot.slane %v1215_v53, 4  ;;  %v2452_v24 = vrot.slane %v2450_v59, 4  ;;  %v3673_v46 = vcombine.low %v4826_v44, %v4828_v13  ;;  %v3760_v15 = vrot.slane %v2400_v2, 9  ;;  %v5111_v8 = vld [vmem:[#allocation2 + $0x64] sm:$0xf] }
 0x335   : > { %v1226_v25 = vrot.slane %v1225_v10, 4  ;;  %v2458_v19 = vsel %vm4987_vm2, %v3759_v9, %v2457_v11  ;;  %v2459_v26 = vrot.slane %v2457_v11, 4  ;;  %v2464_v49 = vrot.slane %v5090_v30, 5  ;;  %v5113_v51 = vld [vmem:[#allocation2 + $0x68] sm:$0x1] }
 0x336   : > { %v1221_v27 = vsel %vm4855_vm14, %v1216_v36, %v1220_v56  ;;  %v2454_v28 = vsel %vm4987_vm2, %v2452_v24, %v2453_v6  ;;  %v2467_v56 = vrot.slane %v5096_v1, 5  ;;  %5612 = vst [vmem:[#allocation3_spill] sm:$0xff] %v5113_v51  ;;  %v3761_v44 = vrot.slane %v2401_v63, 9  ;;  %v2402_v59 = vld [vmem:[#allocation2 + $0x60] sm:$0xe] }
 0x337   : > { %v1231_v4 = vsel %vm4855_vm14, %v1226_v25, %v1230_v55  ;;  %v3768_v37 = vcombine.low %v2451_v20, %v2454_v28  ;;  %v2461_v41 = vsel %vm4987_vm2, %v2459_v26, %v2460_v62  ;;  %v2471_v52 = vrot.slane %v5098_v31, 5  ;;  %v1556_v26 = vld [vmem:[#allocation2 + $0x18] sm:$0xe] }
 0x338   : > { %v3663_v7 = vcombine.low %v1221_v27, %v1231_v4  ;;  %v3769_v42 = vcombine.low %v2458_v19, %v2461_v41  ;;  %v2474_v53 = vrot.slane %v5106_v17, 5  ;;  %v1590_v6 = vrot.slane %v4866_v21, 5  ;;  %v1555_v19 = vld [vmem:[#allocation2 + $0xc] sm:$0xe]  ;;  %v5139_v41 = vld [vmem:[%s5598_s5 + $0x18] sm:$0xff]  }
 0x339   : > { %4093 = vmatmul.mubr.msk.bf16.gmra.mrb[4].mxu0 %vm1265_vm15, %v3768_v37  ;;  %v2465_v9 = vsel %vm4987_vm2, %v3760_v15, %v2464_v49  ;;  %v2466_v10 = vrot.slane %v2464_v49, 4  ;;  %v1593_v55 = vrot.slane %v4868_v23, 5  ;;  %v2472_v11 = vsel %vm4987_vm2, %v3761_v44, %v2471_v52  ;;  %v1558_v15 = vld [vmem:[#allocation2 + $0x30] sm:$0xe] }
 0x33a   : > { %4011 = vmatmul.mubr.msk.bf16.gmra.mrb[12].mxu1 %vm1265_vm15, %v3663_v7  ;;  %4096 = vmatprep.mubr.msk.bf16.mxu0 %vm1265_vm15, %v3769_v42  ;;  %v2473_v62 = vrot.slane %v2471_v52, 4  ;;  %v2478_v36 = vrot.slane %v5111_v8, 5  ;;  %v3762_v24 = vrot.slane %v2402_v59, 9  ;;  %v2481_v25 = vrot.slane %v5113_v51, 5 }
 0x33b   : > { %4016 = vmatprep.mubr.msk.bf16.mxu1 %vm1265_vm15, %v3673_v46  ;;  %v2468_v20 = vsel %vm4987_vm2, %v2466_v10, %v2467_v56  ;;  %v3674_v2 = vcombine.low %v4862_v16, %v4866_v21  ;;  %v3675_v4 = vcombine.low %v4891_v50, %v4895_v54  ;;  %v1557_v46 = vld [vmem:[#allocation2 + $0x24] sm:$0xe]  ;;  %v3691_v63 = vrot.slane %v1555_v19, 9 }
 0x33c   : > { %v3770_v27 = vcombine.low %v2465_v9, %v2468_v20  ;;  %v2475_v23 = vsel %vm4987_vm2, %v2473_v62, %v2474_v53  ;;  %v2480_v28 = vrot.slane %v2478_v36, 4  ;;  %v1592_v7 = vrot.slane %v1590_v6, 4 }
 0x33d   : > { %v3771_v37 = vcombine.low %v2472_v11, %v2475_v23  ;;  %v3692_v42 = vrot.slane %v1556_v26, 9  ;;  %v2479_v16 = vsel %vm4987_vm2, %v3762_v24, %v2478_v36  ;;  %v1597_v50 = vrot.slane %v4895_v54, 5  ;;  %v4348_v36 = vld [vmem:[#allocation2 + $0x18] sm:$0xff]  }
 0x33e   : > { %v2482_v21 = vsel %vm4987_vm2, %v2480_v28, %v2481_v25  ;;  %v5151_v49 = vsel %vm4987_vm2, %v3691_v63, %v1590_v6  ;;  %v5155_v56 = vsel %vm4987_vm2, %v1592_v7, %v1593_v55  ;;  %v1600_v44 = vrot.slane %v4900_v0, 5  ;;  %v1559_v25 = vld [vmem:[#allocation2 + $0x3c] sm:$0xe]  ;;  %v2856_v28 = vld [vmem:[#allocation2 + $0x18] sm:$0xf] }
 0x33f   : > { %v3693_v52 = vrot.slane %v1557_v46, 9  ;;  %v3701_v54 = vcombine.low %v5151_v49, %v5155_v56  ;;  %v5164_v53 = vsel %vm4987_vm2, %v3692_v42, %v1597_v50  ;;  %v1599_v59 = vrot.slane %v1597_v50, 4  ;;  %v1560_v42 = vld [vmem:[#allocation2 + $0x48] sm:$0xe] }
 0x340   : > { %v1604_v6 = vrot.slane %v4933_v22, 5  ;;  %v1607_v9 = vrot.slane %v4943_v58, 5  ;;  %v3694_v0 = vrot.slane %v1558_v15, 9  ;;  %v3772_v10 = vcombine.low %v2479_v16, %v2482_v21 }
 0x341   : > { %4097 = vmatmul.mubr.msk.bf16.gmra.mrb[8].mxu0 %vm1265_vm15, %v3770_v27  ;;  %v1611_v55 = vrot.slane %v4968_v43, 5  ;;  %v1614_v11 = vrot.slane %v4975_v5, 5  ;;  %v3676_v62 = vcombine.low %v4926_v35, %v4933_v22  ;;  %v3677_v19 = vcombine.low %v4963_v40, %v4968_v43 }
 0x342   : > { %4017 = vmatmul.mubr.msk.bf16.vlgmr.msra.gmra.mrb[0].mxu1 %vm1265_vm15, %v3674_v2  ;;  %4100 = vmatprep.mubr.msk.bf16.mxu0 %vm1265_vm15, %v3771_v37  ;;  %v5181_v58 = vsel %vm4987_vm2, %v3693_v52, %v1604_v6  ;;  %v1606_v24 = vrot.slane %v1604_v6, 4  ;;  %v1583_v35 = vrot.slane %v4828_v13, 5  ;;  %v1554_v2 = vld [vmem:[#allocation2] sm:$0xe]  ;;  %v3695_v43 = vrot.slane %v1559_v25, 9  ;;  %v4353_v6 = vld [vmem:[#allocation2 + $0x30] sm:$0xff]  }
 0x343   : > { %4033 = vmatpush3.bf16.msra.mxu1 %v4914_v12  ;;  %4020 = vmatprep.mubr.msk.bf16.mxu1 %vm1265_vm15, %v3675_v4  ;;  %v5171_v12 = vsel %vm4987_vm2, %v1599_v59, %v1600_v44  ;;  %v5187_v26 = vsel %vm4987_vm2, %v3694_v0, %v1611_v55  ;;  %v1613_v5 = vrot.slane %v1611_v55, 4  ;;  %v1586_v23 = vrot.slane %v4830_v45, 5  ;;  %v5207_v4 = vld [vmem:[#allocation2 + $0x1c] sm:$0xf]  ;;  %v4351_v45 = vld [vmem:[#allocation2 + $0x24] sm:$0xff]  }
 0x344   : > { %4050 = vmatprep.subr.bf16.mxu1 %v5139_v41  ;;  %v3702_v20 = vcombine.low %v5164_v53, %v5171_v12  ;;  %v5192_v22 = vsel %vm4987_vm2, %v1606_v24, %v1607_v9  ;;  %v1618_v37 = vrot.slane %v4998_v47, 5  ;;  %v1621_v46 = vrot.slane %v5000_v48, 5  ;;  %v5221_v9 = vld [vmem:[#allocation2 + $0x20] sm:$0x1]  ;;  %v2859_v24 = vld [vmem:[#allocation2 + $0x24] sm:$0xf] }
 0x345   : > { %v5199_v40 = vsel %vm4987_vm2, %v1613_v5, %v1614_v11  ;;  %v3690_v63 = vrot.slane %v1554_v2, 9  ;;  %v1585_v7 = vrot.slane %v1583_v35, 4  ;;  %v2881_v16 = vshrl.u32 %v2856_v28, 16  ;;  %v5251_v2 = vld [vmem:[#allocation2 + $0x28] sm:$0xf] }
 0x346   : > { %v2884_v21 = vshll.u32 %v2856_v28, 16  ;;  %v5213_v50 = vsel %vm4987_vm2, %v3695_v43, %v1618_v37  ;;  %v1620_v15 = vrot.slane %v1618_v37, 4  ;;  %v3678_v44 = vcombine.low %v4982_v3, %v4998_v47  ;;  %v5232_v3 = vld [vmem:[%s5598_s5 + $0x40] sm:$0xff]   ;;  %v1561_v43 = vld [vmem:[#allocation2 + $0x54] sm:$0xe] }
 0x347   : > { %v2890_v52 = vshll.u32 %v5207_v4, 16  ;;  %v2894_v59 = vshrl.u32 %v5207_v4, 16  ;;  %v3679_v48 = vcombine.low %v5011_v61, %v5014_v14  ;;  %v1584_v55 = vsel %vm4987_vm2, %v3690_v63, %v1583_v35  ;;  %v2862_v37 = vld [vmem:[#allocation2 + $0x30] sm:$0xf] }
 0x348   : > { %v5225_v0 = vsel %vm4987_vm2, %v1620_v15, %v1621_v46  ;;  %v1625_v61 = vrot.slane %v5014_v14, 5  ;;  %v1587_v11 = vsel %vm4987_vm2, %v1585_v7, %v1586_v23  ;;  %v1628_v25 = vrot.slane %v5022_v18, 5  ;;  %v4355_v46 = vld [vmem:[#allocation2 + $0x3c] sm:$0xff]  }
 0x349   : > { %4101 = vmatmul.mubr.msk.bf16.gmra.mrb[12].mxu0 %vm1265_vm15, %v3772_v10  ;;  %v3696_v10 = vrot.slane %v1560_v42, 9  ;;  %v2896_v5 = vrot.slane %v2894_v59, 4  ;;  %v3680_v18 = vcombine.low %v5038_v38, %v5049_v39  ;;  %v3700_v23 = vcombine.low %v1584_v55, %v1587_v11  ;;  %v4357_v38 = vld [vmem:[#allocation2 + $0x48] sm:$0xff]  }
 0x34a   : > { %4021 = vmatmul.mubr.msk.bf16.gmra.mrb[4].mxu1 %vm1265_vm15, %v3676_v62  ;;  %4106 = vmatprep.mubr.msk.bf16.mxu0 %vm1265_vm15, %v4348_v36  ;;  %v2883_v62 = vrot.slane %v2881_v16, 4  ;;  %v2886_v36 = vrot.slane %v2884_v21, 5  ;;  %v1627_v35 = vrot.slane %v1625_v61, 4  ;;  %v2905_v7 = vshrl.u32 %v2859_v24, 16  ;;  %v5263_v16 = vld [vmem:[#allocation2 + $0x34] sm:$0xf] }
 0x34b   : > { %4024 = vmatprep.mubr.msk.bf16.mxu1 %vm1265_vm15, %v3677_v19  ;;  %v5243_v19 = vrot.slane %v2890_v52, 5  ;;  %v5247_v14 = vsel %vm4987_vm2, %v3696_v10, %v1625_v61  ;;  %v2908_v42 = vshll.u32 %v2859_v24, 16  ;;  %v2914_v15 = vshll.u32 %v5251_v2, 16  ;;  %v2865_v24 = vld [vmem:[#allocation2 + $0x3c] sm:$0xf] }
 0x34c   : > { %v5259_v28 = vsel %vm4987_vm2, %v1627_v35, %v1628_v25  ;;  %v2887_v63 = vor.u32 %v2886_v36, %v2883_v62  ;;  %v1632_v52 = vrot.slane %v5049_v39, 5  ;;  %v2918_v59 = vshrl.u32 %v5251_v2, 16  ;;  %v5283_v35 = vld [vmem:[#allocation2 + $0x40] sm:$0xf] }
 0x34d   : > { %v2897_v21 = vor.u32 %v2896_v5, %v5243_v19  ;;  %v1635_v10 = vrot.slane %v5054_v57, 5  ;;  %v2938_v55 = vshll.u32 %v5263_v16, 16  ;;  %v2942_v61 = vshrl.u32 %v5263_v16, 16 }
 0x34e   : > { %v1634_v62 = vrot.slane %v1632_v52, 4  ;;  %v2888_v39 = vrot.slane %v2887_v63, 4  ;;  %v2907_v25 = vrot.slane %v2905_v7, 4  ;;  %v2910_v57 = vrot.slane %v2908_v42, 5 }
 0x34f   : > { %v5292_v42 = vrot.slane %v2938_v55, 5  ;;  %v2868_v55 = vld [vmem:[#allocation2 + $0x48] sm:$0xf]  ;;  %vm3500_vm3 = vcmask 64512  }
 0x350   : > { %v5281_v5 = vsel %vm4987_vm2, %v1634_v62, %v1635_v10  ;;  %v2953_v10 = vshrl.u32 %v2865_v24, 16  ;;  %v2956_v62 = vshll.u32 %v2865_v24, 16 }
 0x351   : > { %4107 = vmatmul.mubr.msk.bf16.vlgmr.msra.gmra.mrb[0].mxu0 %vm1265_vm15, %v4351_v45 }
 0x352   : > { %4025 = vmatmul.mubr.msk.bf16.gmra.mrb[8].mxu1 %vm1265_vm15, %v3678_v44  ;;  %4123 = vmatpush3.bf16.msra.mxu0 %v5046_v34  ;;  %v2900_v34 = vshll.u32 %v5221_v9, 16  ;;  %v3697_v44 = vrot.slane %v1561_v43, 9  ;;  %v4358_v43 = vld [vmem:[#allocation2 + $0x54] sm:$0xff]   ;;  %v2955_v27 = vrot.slane %v2953_v10, 4 }
 0x353   : > { %4028 = vmatprep.mubr.msk.bf16.mxu1 %vm1265_vm15, %v3679_v48  ;;  %4110 = vmatprep.mubr.msk.bf16.mxu0 %vm1265_vm15, %v4353_v6  ;;  %v2929_v48 = vshrl.u32 %v2862_v37, 16  ;;  %v2932_v6 = vshll.u32 %v2862_v37, 16  ;;  %v2898_v37 = vrot.slane %v2897_v21, 4  ;;  %v2966_v21 = vshrl.u32 %v5283_v35, 16 }
 0x354   : > { %4140 = vmatprep.subr.bf16.mxu0 %v5232_v3  ;;  %v5274_v11 = vsel %vm4987_vm2, %v3697_v44, %v1632_v52  ;;  %v2902_v36 = vrot.slane %v2900_v34, 5  ;;  %v2920_v34 = vrot.slane %v2918_v59, 4  ;;  %v2944_v44 = vrot.slane %v2942_v61, 4  ;;  %v5294_v52 = vld [vmem:[#allocation2 + $0x38] sm:$0x1] }
 0x355   : > { %v2931_v63 = vrot.slane %v2929_v48, 4  ;;  %v2934_v7 = vrot.slane %v2932_v6, 5  ;;  %v2893_v59 = vsel %vm4855_vm14, %v2888_v39, %v5243_v19  ;;  %v5303_v61 = vld [vmem:[#allocation2 + $0x4c] sm:$0xf]  ;;  %v2948_v13 = vshll.u32 %v5294_v52, 16 }
 0x356   : > { %v2903_v24 = vsel %vm4855_vm14, %v2898_v37, %v2902_v36  ;;  %v2945_v47 = vor.u32 %v2944_v44, %v5292_v42  ;;  %v2958_v19 = vrot.slane %v2956_v62, 5  ;;  %v5317_v36 = vld [vmem:[#allocation2 + $0x44] sm:$0x1]  ;;  %v2980_v37 = vshll.u32 %v2868_v55, 16 }
 0x357   : > { %v2935_v45 = vor.u32 %v2934_v7, %v2931_v63  ;;  %v4360_v63 = vld [vmem:[#allocation2 + $0x6c] sm:$0xff]   ;;  %v3803_v7 = vcombine.low %v2893_v59, %v2903_v24  ;;  %v2950_v10 = vrot.slane %v2948_v13, 5  ;;  %v5329_v62 = vld [vmem:[%s5598_s5 + $0x20] sm:$0xff]   ;;  %v2972_v12 = vshll.u32 %v5317_v36, 16 }
 0x358   : > { %v2163_v59 = vshll.u32 %v5090_v30, 16 }
 0x359   : > { %4111 = vmatmul.mubr.msk.bf16.gmra.mrb[4].mxu0 %vm1265_vm15, %v4355_v46  ;;  %v5286_v46 = vrot.slane %v2914_v15, 5  ;;  %v4359_v15 = vld [vmem:[#allocation2 + $0x60] sm:$0xff]   ;;  %v2936_v44 = vrot.slane %v2935_v45, 4 }
 0x35a   : > { %4029 = vmatmul.mubr.msk.bf16.gmra.mrb[12].mxu1 %vm1265_vm15, %v3680_v18  ;;  %4114 = vmatprep.mubr.msk.bf16.mxu0 %vm1265_vm15, %v4357_v38  ;;  %v5290_v38 = vld [vmem:[#allocation2 + $0x2c] sm:$0x1]  ;;  %v2911_v18 = vor.u32 %v2910_v57, %v2907_v25  ;;  %v2968_v25 = vrot.slane %v2966_v21, 4  ;;  %v2977_v57 = vshrl.u32 %v2868_v55, 16  ;;  %v2874_v55 = vld [vmem:[#allocation2 + $0x60] sm:$0xf] }
 0x35b   : > { %4034 = vmatprep.mubr.msk.bf16.mxu1 %vm1265_vm15, %v3700_v23  ;;  %v2962_v23 = vshll.u32 %v5283_v35, 16  ;;  %v2921_v48 = vor.u32 %v2920_v34, %v5286_v46  ;;  %v2924_v6 = vshll.u32 %v5290_v38, 16  ;;  %v2986_v34 = vshll.u32 %v5303_v61, 16 }
 0x35c   : > { %v2912_v49 = vrot.slane %v2911_v18, 4  ;;  %v5334_v18 = vld [vmem:[#allocation2 + $0x58] sm:$0xf]  ;;  %v2979_v21 = vrot.slane %v2977_v57, 4 }
 0x35d   : > { %v5310_v39 = vrot.slane %v2962_v23, 5  ;;  %v2922_v56 = vrot.slane %v2921_v48, 4  ;;  %v2959_v23 = vor.u32 %v2958_v19, %v2955_v27  ;;  %v5336_v45 = vrot.slane %v2986_v34, 5 }
 0x35e   : > { %v2167_v48 = vshrl.u32 %v5090_v30, 16  ;;  %v2917_v27 = vsel %vm4855_vm14, %v2912_v49, %v5286_v46  ;;  %v3014_v57 = vshrl.u32 %v5334_v18, 16  ;;  %v2941_v30 = vsel %vm4855_vm14, %v2936_v44, %v5292_v42 }
 0x35f   : > { %v2969_v53 = vor.u32 %v2968_v25, %v5310_v39  ;;  %v3010_v25 = vshll.u32 %v5334_v18, 16  ;;  %v2960_v34 = vrot.slane %v2959_v23, 4  ;;  %v5613_v49 = vcombine.low %v5181_v58, %v5192_v22 }
 0x360   : > { %v5614_v42 = vcombine.low %v5187_v26, %v5199_v40  ;;  %v3025_v44 = vshrl.u32 %v2874_v55, 16  ;;  %v2877_v26 = vld [vmem:[#allocation2 + $0x6c] sm:$0xf] }
 0x361   : > { %4115 = vmatmul.mubr.msk.bf16.gmra.mrb[8].mxu0 %vm1265_vm15, %v4358_v43  ;;  %v2990_v43 = vshrl.u32 %v5303_v61, 16  ;;  %v2965_v40 = vsel %vm4855_vm14, %v2960_v34, %v5310_v39  ;;  %v3049_v39 = vshrl.u32 %v2877_v26, 16  ;;  %v3052_v34 = vshll.u32 %v2877_v26, 16  ;;  %v5415_v26 = vld [vmem:[#allocation2 + $0x74] sm:$0x1] }
 0x362   : > { %4035 = vmatmul.mubr.msk.bf16.vlgmr.msra.gmra.mrb[0].mxu1 %vm1265_vm15, %v3701_v54  ;;  %4118 = vmatprep.mubr.msk.bf16.mxu0 %vm1265_vm15, %v4359_v15  ;;  %v2926_v54 = vrot.slane %v2924_v6, 5  ;;  %v2982_v15 = vrot.slane %v2980_v37, 5  ;;  %v5345_v6 = vld [vmem:[#allocation2 + $0x50] sm:$0x1]  ;;  %v5349_v37 = vld [vmem:[#allocation2 + $0x64] sm:$0xf] }
 0x363   : > { %4051 = vmatpush3.bf16.msra.mxu1 %v5139_v41  ;;  %4038 = vmatprep.mubr.msk.bf16.mxu1 %vm1265_vm15, %v3702_v20  ;;  %v2946_v41 = vrot.slane %v2945_v47, 4  ;;  %v2871_v20 = vld [vmem:[#allocation2 + $0x54] sm:$0xf]  ;;  %v2992_v13 = vrot.slane %v2990_v43, 4  ;;  %v2974_v43 = vrot.slane %v2972_v12, 5  ;;  %v3038_v58 = vshrl.u32 %v5349_v37, 16 }
 0x364   : > { %4160 = vmatprep.subr.bf16.mxu1 %v5329_v62  ;;  %v2927_v47 = vsel %vm4855_vm14, %v2922_v56, %v2926_v54  ;;  %v3001_v24 = vshrl.u32 %v2871_v20, 16  ;;  %v3004_v19 = vshll.u32 %v2871_v20, 16  ;;  %v2970_v56 = vrot.slane %v2969_v53, 4 }
 0x365   : > { %v2951_v46 = vsel %vm4855_vm14, %v2946_v41, %v2950_v10  ;;  %v2983_v54 = vor.u32 %v2982_v15, %v2979_v21  ;;  %v2996_v20 = vshll.u32 %v5345_v6, 16  ;;  %v3028_v10 = vshll.u32 %v2874_v55, 16 }
 0x366   : > { %v3034_v41 = vshll.u32 %v5349_v37, 16  ;;  %v3003_v22 = vrot.slane %v3001_v24, 4  ;;  %v3006_v23 = vrot.slane %v3004_v19, 5  ;;  %v3016_v53 = vrot.slane %v3014_v57, 4  ;;  %v5379_v24 = vld [vmem:[#allocation2 + $0x70] sm:$0xf] }
 0x367   : > { %v5372_v12 = vrot.slane %v2163_v59, 5  ;;  %v2169_v21 = vrot.slane %v2167_v48, 4  ;;  %v3804_v15 = vcombine.low %v2917_v27, %v2927_v47  ;;  %v2984_v55 = vrot.slane %v2983_v54, 4 }
 0x368   : > { %v2998_v51 = vrot.slane %v2996_v20, 5  ;;  %v3027_v19 = vrot.slane %v3025_v44, 4  ;;  %v5381_v57 = vrot.slane %v3034_v41, 5  ;;  %v3040_v59 = vrot.slane %v3038_v58, 4 }
 0x369   : > { %4119 = vmatmul.mubr.msk.bf16.gmra.mrb[12].mxu0 %vm1265_vm15, %v4360_v63  ;;  %v2993_v63 = vor.u32 %v2992_v13, %v5336_v45  ;;  %v3805_v13 = vcombine.low %v2941_v30, %v2951_v46  ;;  %v2975_v48 = vsel %vm4855_vm14, %v2970_v56, %v2974_v43  ;;  %v3007_v27 = vor.u32 %v3006_v23, %v3003_v22  ;;  %v5387_v46 = vld [vmem:[#allocation2 + $0x68] sm:$0x1] }
 0x36a   : > { %4039 = vmatmul.mubr.msk.bf16.gmra.mrb[4].mxu1 %vm1265_vm15, %v5613_v49  ;;  %4124 = vmatprep.mubr.msk.bf16.mxu0 %vm1265_vm15, %v3803_v7  ;;  %v5370_v7 = vrot.slane %v3010_v25, 5  ;;  %v5374_v49 = vld [vmem:[#allocation2 + $0x5c] sm:$0x1]  ;;  %v3030_v25 = vrot.slane %v3028_v10, 5  ;;  %v3058_v54 = vshll.u32 %v5379_v24, 16  ;;  %v2170_v20 = vor.u32 %v2169_v21, %v5372_v12 }
 0x36b   : > { %4042 = vmatprep.mubr.msk.bf16.mxu1 %vm1265_vm15, %v5614_v42  ;;  %v2994_v42 = vrot.slane %v2993_v63, 4  ;;  %v3020_v30 = vshll.u32 %v5374_v49, 16  ;;  %v3062_v63 = vshrl.u32 %v5379_v24, 16  ;;  %v2173_v44 = vshll.u32 %v5096_v1, 16 }
 0x36c   : > { %v3017_v47 = vor.u32 %v3016_v53, %v5370_v7  ;;  %v5615_v43 = vcombine.low %v5213_v50, %v5225_v0  ;;  %v2989_v56 = vsel %vm4855_vm14, %v2984_v55, %v5336_v45  ;;  %v5616_v10 = vcombine.low %v5247_v14, %v5259_v28 }
 0x36d   : > { %v2999_v1 = vsel %vm4855_vm14, %v2994_v42, %v2998_v51  ;;  %v3031_v41 = vor.u32 %v3030_v25, %v3027_v19  ;;  %v3041_v50 = vor.u32 %v3040_v59, %v5381_v57  ;;  %v3044_v0 = vshll.u32 %v5387_v46, 16  ;;  %v2024_v25 = vld [vmem:[#allocation2 + $0x48] sm:$0xf] }
 0x36e   : > { %v3008_v58 = vrot.slane %v3007_v27, 4  ;;  %v3018_v22 = vrot.slane %v3017_v47, 4  ;;  %v3022_v23 = vrot.slane %v3020_v30, 5  ;;  %v3051_v45 = vrot.slane %v3049_v39, 4  ;;  %v3242_v39 = vld [vmem:[#allocation2 + $0x18] sm:$0xe] }
 0x36f   : > { %v3054_v53 = vrot.slane %v3052_v34, 5  ;;  %v5411_v21 = vrot.slane %v3058_v54, 5  ;;  %v3064_v14 = vrot.slane %v3062_v63, 4  ;;  %v5413_v28 = vrot.slane %v2173_v44, 5 }
 0x370   : > { %v2171_v51 = vrot.slane %v2170_v20, 4  ;;  %v3032_v55 = vrot.slane %v3031_v41, 4  ;;  %v3042_v42 = vrot.slane %v3041_v50, 4  ;;  %v3046_v19 = vrot.slane %v3044_v0, 5  ;;  %v4363_v0 = vld [vmem:[#allocation2 + $0x18] sm:$0xff]  }
 0x371   : > { %4125 = vmatmul.mubr.msk.bf16.vlgmr.msra.gmra.mrb[0].mxu0 %vm1265_vm15, %v3804_v15  ;;  %v4362_v15 = vld [vmem:[#allocation2 + $0xc] sm:$0xff]   ;;  %v3023_v59 = vsel %vm4855_vm14, %v3018_v22, %v3022_v23  ;;  %v3055_v27 = vor.u32 %v3054_v53, %v3051_v45  ;;  %v3065_v47 = vor.u32 %v3064_v14, %v5411_v21  ;;  %v3068_v30 = vshll.u32 %v5415_v26, 16  ;;  %v3243_v53 = vld [vmem:[#allocation2 + $0x24] sm:$0xe] }
 0x372   : > { %4043 = vmatmul.mubr.msk.bf16.gmra.mrb[8].mxu1 %vm1265_vm15, %v5615_v43  ;;  %4141 = vmatpush3.bf16.msra.mxu0 %v5232_v3  ;;  %v3806_v3 = vcombine.low %v2965_v40, %v2975_v48  ;;  %v3013_v40 = vsel %vm4855_vm14, %v3008_v58, %v5370_v7  ;;  %v3276_v48 = vrot.slane %v5207_v4, 5  ;;  %v5617_v34 = vcombine.low %v5274_v11, %v5281_v5  ;;  %v4364_v58 = vld [vmem:[#allocation2 + $0x24] sm:$0xff]  }
 0x373   : > { %4046 = vmatprep.mubr.msk.bf16.mxu1 %vm1265_vm15, %v5616_v10  ;;  %4128 = vmatprep.mubr.msk.bf16.mxu0 %vm1265_vm15, %v3805_v13  ;;  %v3807_v13 = vcombine.low %v2989_v56, %v2999_v1  ;;  %v2154_v7 = vshrl.u32 %v2024_v25, 16  ;;  %v2157_v54 = vshll.u32 %v2024_v25, 16  ;;  %v3808_v4 = vcombine.low %v3013_v40, %v3023_v59 }
 0x374   : > { %v3037_v63 = vsel %vm4855_vm14, %v3032_v55, %v5381_v57  ;;  %v3047_v20 = vsel %vm4855_vm14, %v3042_v42, %v3046_v19  ;;  %v2176_v11 = vsel %vm4855_vm14, %v2171_v51, %v5413_v28  ;;  %v3820_v5 = vrot.slane %v3242_v39, 9  ;;  %v2021_v57 = vld [vmem:[#allocation2 + $0x3c] sm:$0xf]  ;;  %v4365_v39 = vld [vmem:[#allocation2 + $0x30] sm:$0xff]  }
 0x375   : > { %v3278_v44 = vrot.slane %v3276_v48, 4  ;;  %v3279_v43 = vrot.slane %v5221_v9, 5  ;;  %v2156_v56 = vrot.slane %v2154_v7, 4  ;;  %v3056_v10 = vrot.slane %v3055_v27, 4 }
 0x376   : > { %v3066_v1 = vrot.slane %v3065_v47, 4  ;;  %v3070_v41 = vrot.slane %v3068_v30, 5  ;;  %v2159_v50 = vrot.slane %v2157_v54, 5  ;;  %v3277_v23 = vsel %vm4987_vm2, %v3820_v5, %v3276_v48  ;;  %v2027_v5 = vld [vmem:[#allocation2 + $0x54] sm:$0xf] }
 0x377   : > { %v3280_v45 = vsel %vm4987_vm2, %v3278_v44, %v3279_v43  ;;  %v3283_v14 = vrot.slane %v5251_v2, 5  ;;  %v3061_v9 = vsel %vm4855_vm14, %v3056_v10, %v5411_v21  ;;  %v2130_v55 = vshrl.u32 %v2021_v57, 16  ;;  %v3246_v10 = vld [vmem:[#allocation2 + $0x48] sm:$0xe] }
 0x378   : > { %v2160_v22 = vor.u32 %v2159_v50, %v2156_v56  ;;  %v3071_v28 = vsel %vm4855_vm14, %v3066_v1, %v3070_v41  ;;  %v2133_v42 = vshll.u32 %v2021_v57, 16  ;;  %v2139_v2 = vshll.u32 %v5066_v32, 16 }
 0x379   : > { %4129 = vmatmul.mubr.msk.bf16.gmra.mrb[4].mxu0 %vm1265_vm15, %v3806_v3  ;;  %v3809_v3 = vcombine.low %v3037_v63, %v3047_v20  ;;  %v2143_v19 = vshrl.u32 %v5066_v32, 16  ;;  %v3821_v21 = vrot.slane %v3243_v53, 9  ;;  %v3285_v25 = vrot.slane %v3283_v14, 4  ;;  %v3245_v63 = vld [vmem:[#allocation2 + $0x3c] sm:$0xe]  ;;  %v4367_v53 = vld [vmem:[#allocation2 + $0x48] sm:$0xff]  }
 0x37a   : > { %4047 = vmatmul.mubr.msk.bf16.gmra.mrb[12].mxu1 %vm1265_vm15, %v5617_v34  ;;  %4132 = vmatprep.mubr.msk.bf16.mxu0 %vm1265_vm15, %v3807_v13  ;;  %v3290_v13 = vrot.slane %v5263_v16, 5  ;;  %v2161_v51 = vrot.slane %v2160_v22, 4  ;;  %v3286_v40 = vrot.slane %v5290_v38, 5  ;;  %v3810_v27 = vcombine.low %v3061_v9, %v3071_v28 }
 0x37b   : > { %4052 = vmatprep.mubr.msk.bf16.mxu1 %vm1265_vm15, %v4362_v15  ;;  %v3244_v15 = vld [vmem:[#allocation2 + $0x30] sm:$0xe]  ;;  %v3830_v47 = vcombine.low %v3277_v23, %v3280_v45  ;;  %v3293_v32 = vrot.slane %v5294_v52, 5  ;;  %v2135_v34 = vrot.slane %v2133_v42, 5  ;;  %v5466_v7 = vrot.slane %v2139_v2, 5 }
 0x37c   : > { %v2166_v16 = vsel %vm4855_vm14, %v2161_v51, %v5372_v12  ;;  %v3822_v59 = vrot.slane %v3244_v15, 9  ;;  %v3292_v30 = vrot.slane %v3290_v13, 4  ;;  %v2145_v54 = vrot.slane %v2143_v19, 4  ;;  %v4368_v15 = vld [vmem:[#allocation2 + $0x54] sm:$0xff]   ;;  %v2030_v42 = vld [vmem:[#allocation2 + $0x60] sm:$0xf] }
 0x37d   : > { %v5463_v48 = vcombine.low %v2166_v16, %v2176_v11  ;;  %v3284_v12 = vsel %vm4987_vm2, %v3821_v21, %v3283_v14  ;;  %v3287_v38 = vsel %vm4987_vm2, %v3285_v25, %v3286_v40  ;;  %v3297_v52 = vrot.slane %v5283_v35, 5  ;;  %v3247_v40 = vld [vmem:[#allocation2 + $0x54] sm:$0xe] }
 0x37e   : > { %v3291_v20 = vsel %vm4987_vm2, %v3822_v59, %v3290_v13  ;;  %v2149_v11 = vshll.u32 %v5068_v29, 16  ;;  %v3294_v44 = vsel %vm4987_vm2, %v3292_v30, %v3293_v32  ;;  %v2146_v56 = vor.u32 %v2145_v54, %v5466_v7 }
 0x37f   : > { %v3304_v1 = vrot.slane %v5303_v61, 5  ;;  %v3831_v41 = vcombine.low %v3284_v12, %v3287_v38  ;;  %v3823_v35 = vrot.slane %v3245_v63, 9  ;;  %v3300_v29 = vrot.slane %v5317_v36, 5 }
 0x380   : > { %v2178_v50 = vshrl.u32 %v2027_v5, 16  ;;  %v3832_v57 = vcombine.low %v3291_v20, %v3294_v44  ;;  %v3299_v22 = vrot.slane %v3297_v52, 4  ;;  %v2151_v23 = vrot.slane %v2149_v11, 5 }
 0x381   : > { %4133 = vmatmul.mubr.msk.bf16.gmra.mrb[8].mxu0 %vm1265_vm15, %v3808_v4  ;;  %v4366_v4 = vld [vmem:[#allocation2 + $0x3c] sm:$0xff]   ;;  %v3824_v45 = vrot.slane %v3246_v10, 9  ;;  %v2147_v9 = vrot.slane %v2146_v56, 4  ;;  %v3306_v61 = vrot.slane %v3304_v1, 4  ;;  %v3307_v28 = vrot.slane %v5345_v6, 5 }
 0x382   : > { %4053 = vmatmul.mubr.msk.bf16.vlgmr.msra.gmra.mrb[0].mxu1 %vm1265_vm15, %v4363_v0  ;;  %4136 = vmatprep.mubr.msk.bf16.mxu0 %vm1265_vm15, %v3809_v3  ;;  %v2181_v0 = vshll.u32 %v2027_v5, 16  ;;  %v2187_v3 = vshll.u32 %v5098_v31, 16  ;;  %v2180_v13 = vrot.slane %v2178_v50, 4  ;;  %v3301_v2 = vsel %vm4987_vm2, %v3299_v22, %v3300_v29 }
 0x383   : > { %4161 = vmatpush3.bf16.msra.mxu1 %v5329_v62  ;;  %4056 = vmatprep.mubr.msk.bf16.mxu1 %vm1265_vm15, %v4364_v58  ;;  %v2132_v62 = vrot.slane %v2130_v55, 4  ;;  %v2191_v58 = vshrl.u32 %v5098_v31, 16  ;;  %v3298_v31 = vsel %vm4987_vm2, %v3823_v35, %v3297_v52  ;;  %v3305_v19 = vsel %vm4987_vm2, %v3824_v45, %v3304_v1 }
 0x384   : > { %v2183_v51 = vrot.slane %v2181_v0, 5  ;;  %v2189_v36 = vrot.slane %v2187_v3, 5  ;;  %v3311_v21 = vrot.slane %v5334_v18, 5  ;;  %v2152_v16 = vsel %vm4855_vm14, %v2147_v9, %v2151_v23  ;;  %v3248_v18 = vld [vmem:[#allocation2 + $0x60] sm:$0xe]  ;;  %v5618_v0 = vld [vmem:[#allocation3_spill] sm:$0xff] }
 0x385   : > { %v2136_v43 = vor.u32 %v2135_v34, %v2132_v62  ;;  %v2193_v55 = vrot.slane %v2191_v58, 4  ;;  %v3308_v25 = vsel %vm4987_vm2, %v3306_v61, %v3307_v28  ;;  %v3318_v59 = vrot.slane %v5349_v37, 5  ;;  %v4369_v37 = vld [vmem:[#allocation2 + $0x60] sm:$0xff]   ;;  %v3249_v58 = vld [vmem:[#allocation2 + $0x6c] sm:$0xe] }
 0x386   : > { %v2211_v30 = vshll.u32 %v5111_v8, 16  ;;  %v2215_v32 = vshrl.u32 %v5111_v8, 16  ;;  %v2184_v62 = vor.u32 %v2183_v51, %v2180_v13  ;;  %v3834_v54 = vcombine.low %v3305_v19, %v3308_v25 }
 0x387   : > { %v2137_v14 = vrot.slane %v2136_v43, 4  ;;  %v2194_v34 = vor.u32 %v2193_v55, %v2189_v36  ;;  %v3313_v12 = vrot.slane %v3311_v21, 4  ;;  %v3314_v38 = vrot.slane %v5374_v49, 5 }
 0x388   : > { %v3826_v20 = vrot.slane %v3248_v18, 9  ;;  %v3320_v52 = vrot.slane %v3318_v59, 4  ;;  %v3321_v11 = vrot.slane %v5387_v46, 5  ;;  %v2213_v43 = vrot.slane %v2211_v30, 5 }
 0x389   : > { %4137 = vmatmul.mubr.msk.bf16.gmra.mrb[12].mxu0 %vm1265_vm15, %v3810_v27  ;;  %v2142_v6 = vsel %vm4855_vm14, %v2137_v14, %v5466_v7  ;;  %v2202_v27 = vshrl.u32 %v2030_v42, 16  ;;  %v2197_v7 = vshll.u32 %v5106_v17, 16  ;;  %v2217_v8 = vrot.slane %v2215_v32, 4 }
 0x38a   : > { %4057 = vmatmul.mubr.msk.bf16.gmra.mrb[4].mxu1 %vm1265_vm15, %v4365_v39  ;;  %4142 = vmatprep.mubr.msk.bf16.mxu0 %vm1265_vm15, %v3830_v47  ;;  %v2205_v47 = vshll.u32 %v2030_v42, 16  ;;  %v3833_v39 = vcombine.low %v3298_v31, %v3301_v2  ;;  %v3742_v63 = vcombine.low %v2142_v6, %v2152_v16  ;;  %v2185_v56 = vrot.slane %v2184_v62, 4 }
 0x38b   : > { %4060 = vmatprep.mubr.msk.bf16.mxu1 %vm1265_vm15, %v4366_v4  ;;  %v3825_v4 = vrot.slane %v3247_v40, 9  ;;  %v2204_v5 = vrot.slane %v2202_v27, 4  ;;  %v2195_v10 = vrot.slane %v2194_v34, 4  ;;  %v2199_v1 = vrot.slane %v2197_v7, 5 }
 0x38c   : > { %v2207_v44 = vrot.slane %v2205_v47, 5  ;;  %v3315_v49 = vsel %vm4987_vm2, %v3313_v12, %v3314_v38  ;;  %v3319_v46 = vsel %vm4987_vm2, %v3826_v20, %v3318_v59  ;;  %v3322_v35 = vsel %vm4987_vm2, %v3320_v52, %v3321_v11 }
 0x38d   : > { %v3312_v17 = vsel %vm4987_vm2, %v3825_v4, %v3311_v21  ;;  %v2218_v50 = vor.u32 %v2217_v8, %v2213_v43  ;;  %v2221_v3 = vshll.u32 %v5618_v0, 16  ;;  %v2200_v22 = vsel %vm4855_vm14, %v2195_v10, %v2199_v1 }
 0x38e   : > { %v2208_v29 = vor.u32 %v2207_v44, %v2204_v5  ;;  %v3835_v23 = vcombine.low %v3312_v17, %v3315_v49  ;;  %v3836_v45 = vcombine.low %v3319_v46, %v3322_v35  ;;  %v3328_v14 = vrot.slane %v5415_v26, 5 }
 0x38f   : > { %v2219_v28 = vrot.slane %v2218_v50, 4 }
 0x390   : > { %v2209_v61 = vrot.slane %v2208_v29, 4 }
 0x391   : > { %4143 = vmatmul.mubr.msk.bf16.vlgmr.msra.gmra.mrb[0].mxu0 %vm1265_vm15, %v3831_v41  ;;  %v3325_v41 = vrot.slane %v5379_v24, 5 }
 0x392   : > { %4061 = vmatmul.mubr.msk.bf16.gmra.mrb[8].mxu1 %vm1265_vm15, %v4367_v53  ;;  %4146 = vmatprep.mubr.msk.bf16.mxu0 %vm1265_vm15, %v3832_v57  ;;  %v2190_v57 = vsel %vm4855_vm14, %v2185_v56, %v2189_v36  ;;  %v3827_v53 = vrot.slane %v3249_v58, 9  ;;  %v2214_v26 = vsel %vm4855_vm14, %v2209_v61, %v2213_v43 }
 0x393   : > { %4064 = vmatprep.mubr.msk.bf16.mxu1 %vm1265_vm15, %v4368_v15  ;;  %v3327_v24 = vrot.slane %v3325_v41, 4  ;;  %v3744_v9 = vcombine.low %v2190_v57, %v2200_v22  ;;  %v2223_v15 = vrot.slane %v2221_v3, 5 }
 0x394   : > { %v3326_v13 = vsel %vm4987_vm2, %v3827_v53, %v3325_v41 }
 0x395   : > { %v3329_v51 = vsel %vm4987_vm2, %v3327_v24, %v3328_v14  ;;  %v2224_v36 = vsel %vm4855_vm14, %v2219_v28, %v2223_v15 }
 0x396   : > { %v3837_v55 = vcombine.low %v3326_v13, %v3329_v51  ;;  %v3745_v42 = vcombine.low %v2214_v26, %v2224_v36 }
 0x399   : > { %4147 = vmatmul.mubr.msk.bf16.gmra.mrb[4].mxu0 %vm1265_vm15, %v3833_v39 }
 0x39a   : > { %4065 = vmatmul.mubr.msk.bf16.gmra.mrb[12].mxu1 %vm1265_vm15, %v4369_v37  ;;  %4150 = vmatprep.mubr.msk.bf16.mxu0 %vm1265_vm15, %v3834_v54 }
 0x39b   : > { %4078 = vmatprep.mubr.msk.bf16.mxu1 %vm1265_vm15, %v3742_v63 }
 0x3a1   : > { %4151 = vmatmul.mubr.msk.bf16.gmra.mrb[8].mxu0 %vm1265_vm15, %v3835_v23 }
 0x3a2   : > { %4079 = vmatmul.mubr.msk.bf16.vlgmr.msra.gmra.mrb[8].mxu1 %vm1265_vm15, %v5463_v48  ;;  %4154 = vmatprep.mubr.msk.bf16.mxu0 %vm1265_vm15, %v3836_v45 }
 0x3a3   : > { %4082 = vmatprep.mubr.msk.bf16.mxu1 %vm1265_vm15, %v3744_v9 }
 0x3a9   : > { %4155 = vmatmul.mubr.msk.bf16.gmra.mrb[12].mxu0 %vm1265_vm15, %v3837_v55 }
 0x3aa   : > { %4083 = vmatmul.mubr.msk.bf16.gmra.mrb[12].mxu1 %vm1265_vm15, %v3745_v42 }
 0x455   : > { %v4054_v48 = vpop.f32.mrb[0].mxu1 }
 0x456   : > { %v1930_v31 = vpop.f32.mrb[1].mxu1 }
 0x457   : > { %v4055_v33 = vpop.f32.mrb[2].mxu1 }
 0x458   : > { %v1933_v2 = vpop.f32.mrb[3].mxu1 }
 0x45d   : > { %v4058_v19 = vpop.f32.mrb[4].mxu1 }
 0x45e   : > { %v1946_v21 = vpop.f32.mrb[5].mxu1 }
 0x45f   : > { %v4059_v6 = vpop.f32.mrb[6].mxu1 }
 0x460   : > { %v1949_v16 = vpop.f32.mrb[7].mxu1 }
 0x464   : > { %v4144_v60 = vpop.f32.mrb[0].mxu0 }
 0x465   : > { %v4162_v25 = vadd.f32 %v4144_v60, %v4054_v48  ;;  %v3421_v40 = vpop.f32.mrb[1].mxu0 }
 0x466   : > { %v4163_v59 = vadd.f32 %v3421_v40, %v1930_v31  ;;  %v4145_v18 = vpop.f32.mrb[2].mxu0 }
 0x467   : > { %3503 = vst.msk [vmem:[%s4562_s28 + $0x10] sm:$0xff] %vm3500_vm3, %v4162_v25  ;;  %v4164_v27 = vadd.f32 %v4145_v18, %v4055_v33  ;;  %v3424_v47 = vpop.f32.mrb[3].mxu0 }
 0x468   : > { %3501 = vst.msk [vmem:[%s4562_s28] sm:$0xff] %vm3500_vm3, %v4163_v59  ;;  %v4165_v30 = vadd.f32 %v3424_v47, %v1933_v2 }
 0x469   : > { %3504 = vst.msk [vmem:[%s4562_s28 + $0x18] sm:$0xff] %vm3500_vm3, %v4164_v27 }
 0x46a   : > { %3502 = vst.msk [vmem:[%s4562_s28 + $0x8] sm:$0xff] %vm3500_vm3, %v4165_v30 }
 0x46c   : > { %v4148_v32 = vpop.f32.mrb[4].mxu0 }
 0x46d   : > { %v4166_v39 = vadd.f32 %v4148_v32, %v4058_v19  ;;  %v3437_v62 = vpop.f32.mrb[5].mxu0 }
 0x46e   : > { %v4167_v34 = vadd.f32 %v3437_v62, %v1946_v21  ;;  %v4149_v7 = vpop.f32.mrb[6].mxu0 }
 0x46f   : > { %3507 = vst.msk [vmem:[%s4562_s28 + $0x30] sm:$0xff] %vm3500_vm3, %v4166_v39  ;;  %v4168_v54 = vadd.f32 %v4149_v7, %v4059_v6  ;;  %v3440_v4 = vpop.f32.mrb[7].mxu0 }
 0x470   : > { %3505 = vst.msk [vmem:[%s4562_s28 + $0x20] sm:$0xff] %vm3500_vm3, %v4167_v34  ;;  %v4169_v12 = vadd.f32 %v3440_v4, %v1949_v16 }
 0x471   : > { %3508 = vst.msk [vmem:[%s4562_s28 + $0x38] sm:$0xff] %vm3500_vm3, %v4168_v54 }
 0x472   : > { %3506 = vst.msk [vmem:[%s4562_s28 + $0x28] sm:$0xff] %vm3500_vm3, %v4169_v12 }
 0x474   : > { %v4152_v38 = vpop.f32.mrb[8].mxu0 }
 0x475   : > { %v4080_v37 = vpop.f32.mrb[8].mxu1  ;;  %v3453_v63 = vpop.f32.mrb[9].mxu0 }
 0x476   : > { %v4170_v20 = vadd.f32 %v4152_v38, %v4080_v37  ;;  %v2348_v52 = vpop.f32.mrb[9].mxu1  ;;  %v4153_v11 = vpop.f32.mrb[10].mxu0 }
 0x477   : > { %v4171_v5 = vadd.f32 %v3453_v63, %v2348_v52  ;;  %v4081_v44 = vpop.f32.mrb[10].mxu1  ;;  %v3456_v43 = vpop.f32.mrb[11].mxu0 }
 0x478   : > { %3511 = vst.msk [vmem:[%s4562_s28 + $0x50] sm:$0xff] %vm3500_vm3, %v4170_v20  ;;  %v4172_v8 = vadd.f32 %v4153_v11, %v4081_v44  ;;  %v2351_v56 = vpop.f32.mrb[11].mxu1 }
 0x479   : > { %3509 = vst.msk [vmem:[%s4562_s28 + $0x40] sm:$0xff] %vm3500_vm3, %v4171_v5  ;;  %v4173_v10 = vadd.f32 %v3456_v43, %v2351_v56 }
 0x47a   : > { %3512 = vst.msk [vmem:[%s4562_s28 + $0x58] sm:$0xff] %vm3500_vm3, %v4172_v8 }
 0x47b   : > { %3510 = vst.msk [vmem:[%s4562_s28 + $0x48] sm:$0xff] %vm3500_vm3, %v4173_v10 }
 0x47c   : > { %v4156_v1 = vpop.f32.mrb[12].mxu0 }
 0x47d   : > { %v4084_v17 = vpop.f32.mrb[12].mxu1  ;;  %v3469_v49 = vpop.f32.mrb[13].mxu0 }
 0x47e   : > { %v4174_v46 = vadd.f32 %v4156_v1, %v4084_v17  ;;  %v2364_v41 = vpop.f32.mrb[13].mxu1  ;;  %v4157_v35 = vpop.f32.mrb[14].mxu0 }
 0x47f   : > { %v4175_v29 = vadd.f32 %v3469_v49, %v2364_v41  ;;  %v4085_v50 = vpop.f32.mrb[14].mxu1  ;;  %v3472_v0 = vpop.f32.mrb[15].mxu0 }
 0x480   : > { %3515 = vst.msk [vmem:[%s4562_s28 + $0x70] sm:$0xff] %vm3500_vm3, %v4174_v46  ;;  %v4176_v3 = vadd.f32 %v4157_v35, %v4085_v50  ;;  %v2367_v58 = vpop.f32.mrb[15].mxu1 }
 0x481   : > { %3513 = vst.msk [vmem:[%s4562_s28 + $0x60] sm:$0xff] %vm3500_vm3, %v4175_v29  ;;  %v4177_v57 = vadd.f32 %v3472_v0, %v2367_v58 }
 0x482   : > { %3516 = vst.msk [vmem:[%s4562_s28 + $0x78] sm:$0xff] %vm3500_vm3, %v4176_v3 }
 0x483   : > { %3514 = vst.msk [vmem:[%s4562_s28 + $0x68] sm:$0xff] %vm3500_vm3, %v4177_v57 }
 0x484 PF: > { %s16_s25 = sadd.s32 1, %s4409_s25   ;;  %s5619_s21 = smov %s4401_s23 }
 0x485   : > { %p13_p9 = scmp.ge.s32.totalorder %s16_s25, 6   ;;  %s5620_s22 = smov %s4405_s24 }
 0x486   : > { %s5621_s23 = smov %s5624_s26  ;;  %s5622_s24 = smov %s5628_s27 }
 0x487   :  { %15 = sbr.rel (!%p13_p9) target bundleno = 3 (0x3), region = 96 }

</bundles_post_ra>
